<compile_context>
chip_gen: v5e
topology: v5e:2x2
jax: 0.10.0
libtpu: 0.0.40
codegen_flags: <defaults>
</compile_context>

<pallas_src>
import functools

import jax
import jax.numpy as jnp
from jax.experimental import pallas as pl
from jax.experimental.pallas import tpu as pltpu

LANE = 128


def _round_up(n, m):
    return (n + m - 1) // m * m


def _pick_tile_m(batch, desired=1024):
    """Batch-tile selection: multiple of 8, prefer >=2 grid steps (v7x dual-TC),
    keep batch round-up waste under ~12.5%, clamp for tiny batches."""
    cap = _round_up(batch, 8)
    tile = max(8, (min(desired, cap) // 8) * 8)
    # Prefer at least 2 grid steps so dimension_semantics=("parallel",) can
    # actually shard the batch axis across both v7x TensorCores.
    while tile >= 16 and pl.cdiv(batch, tile) < 2:
        tile = max(8, (tile // 2 // 8) * 8)
    # Keep batch round-up padding waste under ~12.5%.
    while tile > 128 and (_round_up(batch, tile) - batch) * 8 > batch:
        tile = max(128, (tile // 2 // 8) * 8)
    return tile


def mlp_kernel(x_ref, w1_ref, b1_ref, w2_ref, b2_ref, w3_ref, b3_ref, o_ref):
    # x tile: (TILE_M, in_dim) f32 straight from HBM; cast to bf16 on-chip so
    # the MXU runs its bf16 path while HBM only ever sees the f32 original.
    x = x_ref[...].astype(w1_ref.dtype)

    f1 = jnp.dot(x, w1_ref[...], preferred_element_type=jnp.float32) + b1_ref[...]
    r1 = jnp.maximum(f1, 0.0).astype(w2_ref.dtype)

    f2 = jnp.dot(r1, w2_ref[...], preferred_element_type=jnp.float32) + b2_ref[...]
    r2 = jnp.maximum(f2, 0.0).astype(w3_ref.dtype)

    # Padded class lanes need no explicit mask: w3's padded columns are zero and
    # b3's padded lanes were pre-poisoned to a huge negative value, so f3 there
    # is effectively -inf for the softmax.
    f3 = jnp.dot(r2, w3_ref[...], preferred_element_type=jnp.float32) + b3_ref[...]

    # Numerically stable log_softmax along the class axis (EUP exp/log, XLU
    # reductions — off the MXU/HBM critical path).
    m = jnp.max(f3, axis=-1, keepdims=True)
    shifted = f3 - m
    lse = jnp.log(jnp.sum(jnp.exp(shifted), axis=-1, keepdims=True))
    o_ref[...] = (shifted - lse).astype(o_ref.dtype)


def mlp_forward(x, w1, b1, w2, b2, w3, b3, *, tile_m=1024,
                weight_dtype=jnp.bfloat16):
    batch, in_dim = x.shape
    h1 = w1.shape[1]
    h2 = w2.shape[1]
    num_classes = w3.shape[1]

    # Lane-pad hidden/class dims; pick the batch tile and pad batch rows only
    # when necessary (no dtype change, no copy when already aligned).
    h1p = _round_up(h1, LANE)
    h2p = _round_up(h2, LANE)
    ncp = _round_up(num_classes, LANE)
    tile_m = _pick_tile_m(batch, desired=tile_m)
    bp = _round_up(batch, tile_m)

    xp = x if bp == batch else jnp.pad(x, ((0, bp - batch), (0, 0)))

    def pad2(a, rows, cols, dtype):
        return jnp.pad(a, ((0, rows - a.shape[0]), (0, cols - a.shape[1]))
                       ).astype(dtype)

    w1p = pad2(w1, in_dim, h1p, weight_dtype)
    w2p = pad2(w2, h1p, h2p, weight_dtype)
    w3p = pad2(w3, h2p, ncp, weight_dtype)
    b1p = pad2(b1.reshape(1, -1), 1, h1p, jnp.float32)
    b2p = pad2(b2.reshape(1, -1), 1, h2p, jnp.float32)
    # Bake the class-padding mask into b3: padded lanes get a huge negative bias
    # (w3's padded columns are zero, so f3 at those lanes equals the bias).
    neg_big = float(jnp.finfo(jnp.float32).min) / 2
    b3p = jnp.full((1, ncp), neg_big, jnp.float32)
    b3p = b3p.at[:, :num_classes].set(b3.reshape(1, -1).astype(jnp.float32))

    # Advisory cost estimate — use the actually streamed (padded) sizes.
    wbytes = (w1p.size + w2p.size + w3p.size) * jnp.dtype(weight_dtype).itemsize
    bbytes = (b1p.size + b2p.size + b3p.size) * 4
    flops = 2 * bp * (in_dim * h1p + h1p * h2p + h2p * ncp)
    transcendentals = bp * (ncp + 1)                       # exp per lane + log
    bytes_accessed = xp.size * 4 + wbytes + bbytes + bp * ncp * 4

    # VMEM footprint (double-buffered x/out tiles + resident weights + live
    # f32/bf16 intermediates), with headroom; capped at v7x's 64 MiB physical.
    vmem_est = (2 * tile_m * in_dim * 4
                + 2 * tile_m * ncp * 4
                + 2 * (wbytes + bbytes)
                + tile_m * (h1p + h2p + ncp) * 6)
    vmem_limit = int(min(64 << 20, max(2 * vmem_est, 32 << 20)))

    full = lambda a: pl.BlockSpec(a.shape, lambda i: (0,) * a.ndim)

    out_padded = pl.pallas_call(
        mlp_kernel,
        out_shape=jax.ShapeDtypeStruct((bp, ncp), jnp.float32),
        grid=(bp // tile_m,),
        in_specs=[
            pl.BlockSpec((tile_m, in_dim), lambda i: (i, 0)),   # x streams (f32)
            full(w1p), full(b1p),                               # weights resident
            full(w2p), full(b2p),
            full(w3p), full(b3p),
        ],
        out_specs=pl.BlockSpec((tile_m, ncp), lambda i: (i, 0)),
        compiler_params=pltpu.CompilerParams(
            dimension_semantics=("parallel",),
            vmem_limit_bytes=vmem_limit),
        cost_estimate=pl.CostEstimate(
            flops=flops,
            transcendentals=transcendentals,
            bytes_accessed=bytes_accessed),
    )(xp, w1p, b1p, w2p, b2p, w3p, b3p)

    return out_padded[:batch, :num_classes]


def init_linear_params(key, in_features, out_features):
    # Mimics PyTorch nn.Linear default init: U(-1/sqrt(in), 1/sqrt(in)).
    kw, kb = jax.random.split(key)
    bound = 1.0 / (in_features ** 0.5)
    # Stored as [in, out] (transpose of PyTorch's [out, in]) for x @ W.
    w = jax.random.uniform(kw, (in_features, out_features), jnp.float32, -bound, bound)
    b = jax.random.uniform(kb, (1, out_features), jnp.float32, -bound, bound)
    return w, b


def reference_forward(x, w1, b1, w2, b2, w3, b3, dtype=jnp.float32):
    # Pure-JAX reference; `dtype` controls matmul-input quantization so we can
    # check tightly against the bf16 kernel and loosely against f32 math.
    cast = lambda a: a.astype(dtype)
    r1 = jnp.maximum(
        jnp.dot(cast(x), cast(w1), preferred_element_type=jnp.float32) + b1, 0.0)
    r2 = jnp.maximum(
        jnp.dot(cast(r1), cast(w2), preferred_element_type=jnp.float32) + b2, 0.0)
    f3 = jnp.dot(cast(r2), cast(w3), preferred_element_type=jnp.float32) + b3
    return jax.nn.log_softmax(f3, axis=1)


if __name__ == "__main__":
    input_size = 28 * 28      # 784, as in the module's defaults
    layers = [120, 84]
    output_size = 10
    batch = 256               # >=2 grid steps — exercises the batch pipeline

    key = jax.random.PRNGKey(0)
    kx, k1, k2, k3 = jax.random.split(key, 4)

    x = jax.random.normal(kx, (batch, input_size), jnp.float32)
    w1, b1 = init_linear_params(k1, input_size, layers[0])
    w2, b2 = init_linear_params(k2, layers[0], layers[1])
    w3, b3 = init_linear_params(k3, layers[1], output_size)

    out = jax.block_until_ready(mlp_forward(x, w1, b1, w2, b2, w3, b3))
    assert out.shape == (batch, output_size)

    ref_bf16 = reference_forward(x, w1, b1, w2, b2, w3, b3, dtype=jnp.bfloat16)
    ref_f32 = reference_forward(x, w1, b1, w2, b2, w3, b3, dtype=jnp.float32)
    assert jnp.allclose(out, ref_bf16, atol=5e-3, rtol=5e-3), \
        "mismatch vs bf16-quantized JAX reference"
    assert jnp.allclose(out, ref_f32, atol=6e-2, rtol=6e-2), \
        "drift vs f32 JAX reference too large"

    print("KERNEL_OK")
</pallas_src>

<mosaic_0001>
module attributes {stable_mosaic.version = 11 : i64} {
  func.func @mlp_kernel(%arg0: i32, %arg1: memref<128x784xf32, #tpu.memory_space<vmem>>, %arg2: memref<784x128xbf16, #tpu.memory_space<vmem>>, %arg3: memref<1x128xf32, #tpu.memory_space<vmem>>, %arg4: memref<128x128xbf16, #tpu.memory_space<vmem>>, %arg5: memref<1x128xf32, #tpu.memory_space<vmem>>, %arg6: memref<128x128xbf16, #tpu.memory_space<vmem>>, %arg7: memref<1x128xf32, #tpu.memory_space<vmem>>, %arg8: memref<128x128xf32, #tpu.memory_space<vmem>>) attributes {dimension_semantics = [#tpu.dimension_semantics<parallel>], iteration_bounds = array<i64: 2>, scalar_prefetch = 0 : i64, scratch_operands = 0 : i64, tpu.core_type = #tpu.core_type<tc>, window_params = [{transform_indices = @transform_0, window_bounds = array<i64: 128, 784>}, {pipeline_mode = #tpu.pipeline_mode<synchronous>, transform_indices = @transform_1, window_bounds = array<i64: 784, 128>}, {pipeline_mode = #tpu.pipeline_mode<synchronous>, transform_indices = @transform_2, window_bounds = array<i64: 1, 128>}, {pipeline_mode = #tpu.pipeline_mode<synchronous>, transform_indices = @transform_3, window_bounds = array<i64: 128, 128>}, {pipeline_mode = #tpu.pipeline_mode<synchronous>, transform_indices = @transform_4, window_bounds = array<i64: 1, 128>}, {pipeline_mode = #tpu.pipeline_mode<synchronous>, transform_indices = @transform_5, window_bounds = array<i64: 128, 128>}, {pipeline_mode = #tpu.pipeline_mode<synchronous>, transform_indices = @transform_6, window_bounds = array<i64: 1, 128>}, {transform_indices = @transform_7, window_bounds = array<i64: 128, 128>}]} {
    %c0 = arith.constant 0 : index
    %c0_0 = arith.constant 0 : index
    %0 = vector.load %arg1[%c0, %c0_0] : memref<128x784xf32, #tpu.memory_space<vmem>>, vector<128x784xf32>
    %1 = arith.truncf %0 : vector<128x784xf32> to vector<128x784xbf16>
    %c0_1 = arith.constant 0 : index
    %c0_2 = arith.constant 0 : index
    %2 = vector.load %arg2[%c0_1, %c0_2] : memref<784x128xbf16, #tpu.memory_space<vmem>>, vector<784x128xbf16>
    %cst = arith.constant dense<0.000000e+00> : vector<128x128xf32>
    %3 = tpu.matmul %1, %2, %cst {dimension_numbers = #tpu.dot_dimension_numbers<[1], [0], [0], [1], [0, 0, 1, 1], [], []>} : vector<128x784xbf16>, vector<784x128xbf16>, vector<128x128xf32> -> vector<128x128xf32>
    %c0_3 = arith.constant 0 : index
    %c0_4 = arith.constant 0 : index
    %4 = vector.load %arg3[%c0_3, %c0_4] : memref<1x128xf32, #tpu.memory_space<vmem>>, vector<1x128xf32>
    %5 = vector.broadcast %4 : vector<1x128xf32> to vector<128x128xf32>
    %6 = arith.addf %3, %5 : vector<128x128xf32>
    %cst_5 = arith.constant 0.000000e+00 : f32
    %7 = vector.broadcast %cst_5 : f32 to vector<128x128xf32>
    %8 = arith.maximumf %6, %7 : vector<128x128xf32>
    %9 = arith.truncf %8 : vector<128x128xf32> to vector<128x128xbf16>
    %c0_6 = arith.constant 0 : index
    %c0_7 = arith.constant 0 : index
    %10 = vector.load %arg4[%c0_6, %c0_7] : memref<128x128xbf16, #tpu.memory_space<vmem>>, vector<128x128xbf16>
    %cst_8 = arith.constant dense<0.000000e+00> : vector<128x128xf32>
    %11 = tpu.matmul %9, %10, %cst_8 {dimension_numbers = #tpu.dot_dimension_numbers<[1], [0], [0], [1], [0, 0, 1, 1], [], []>} : vector<128x128xbf16>, vector<128x128xbf16>, vector<128x128xf32> -> vector<128x128xf32>
    %c0_9 = arith.constant 0 : index
    %c0_10 = arith.constant 0 : index
    %12 = vector.load %arg5[%c0_9, %c0_10] : memref<1x128xf32, #tpu.memory_space<vmem>>, vector<1x128xf32>
    %13 = vector.broadcast %12 : vector<1x128xf32> to vector<128x128xf32>
    %14 = arith.addf %11, %13 : vector<128x128xf32>
    %cst_11 = arith.constant 0.000000e+00 : f32
    %15 = vector.broadcast %cst_11 : f32 to vector<128x128xf32>
    %16 = arith.maximumf %14, %15 : vector<128x128xf32>
    %17 = arith.truncf %16 : vector<128x128xf32> to vector<128x128xbf16>
    %c0_12 = arith.constant 0 : index
    %c0_13 = arith.constant 0 : index
    %18 = vector.load %arg6[%c0_12, %c0_13] : memref<128x128xbf16, #tpu.memory_space<vmem>>, vector<128x128xbf16>
    %cst_14 = arith.constant dense<0.000000e+00> : vector<128x128xf32>
    %19 = tpu.matmul %17, %18, %cst_14 {dimension_numbers = #tpu.dot_dimension_numbers<[1], [0], [0], [1], [0, 0, 1, 1], [], []>} : vector<128x128xbf16>, vector<128x128xbf16>, vector<128x128xf32> -> vector<128x128xf32>
    %c0_15 = arith.constant 0 : index
    %c0_16 = arith.constant 0 : index
    %20 = vector.load %arg7[%c0_15, %c0_16] : memref<1x128xf32, #tpu.memory_space<vmem>>, vector<1x128xf32>
    %21 = vector.broadcast %20 : vector<1x128xf32> to vector<128x128xf32>
    %22 = arith.addf %19, %21 : vector<128x128xf32>
    %cst_17 = arith.constant dense<0xFF800000> : vector<128xf32>
    %23 = vector.multi_reduction <maximumf>, %22, %cst_17 [1] : vector<128x128xf32> to vector<128xf32>
    %24 = vector.shape_cast %23 : vector<128xf32> to vector<128x1xf32>
    %25 = vector.broadcast %24 : vector<128x1xf32> to vector<128x128xf32>
    %26 = arith.subf %22, %25 : vector<128x128xf32>
    %27 = math.exp %26 : vector<128x128xf32>
    %cst_18 = arith.constant dense<0.000000e+00> : vector<128xf32>
    %28 = vector.multi_reduction <add>, %27, %cst_18 [1] : vector<128x128xf32> to vector<128xf32>
    %29 = vector.shape_cast %28 : vector<128xf32> to vector<128x1xf32>
    %30 = math.log %29 : vector<128x1xf32>
    %31 = vector.broadcast %30 : vector<128x1xf32> to vector<128x128xf32>
    %32 = arith.subf %26, %31 : vector<128x128xf32>
    %c0_19 = arith.constant 0 : index
    %c0_20 = arith.constant 0 : index
    %33 = vector.load %arg8[%c0_19, %c0_20] : memref<128x128xf32, #tpu.memory_space<vmem>>, vector<128x128xf32>
    tpu.vector_store %arg8[%c0_19, %c0_20], %32 {strides = array<i32>} : memref<128x128xf32, #tpu.memory_space<vmem>>, vector<128x128xf32>,
    return
  }
  func.func @transform_0(%arg0: i32) -> (i32, i32) {
    %c0_i32 = arith.constant 0 : i32
    %c0_i32_0 = arith.constant 0 : i32
    return %arg0, %c0_i32 : i32, i32
  }
  func.func @transform_1(%arg0: i32) -> (i32, i32) {
    %c0_i32 = arith.constant 0 : i32
    %c0_i32_0 = arith.constant 0 : i32
    %c0_i32_1 = arith.constant 0 : i32
    return %c0_i32, %c0_i32_0 : i32, i32
  }
  func.func @transform_2(%arg0: i32) -> (i32, i32) {
    %c0_i32 = arith.constant 0 : i32
    %c0_i32_0 = arith.constant 0 : i32
    %c0_i32_1 = arith.constant 0 : i32
    return %c0_i32, %c0_i32_0 : i32, i32
  }
  func.func @transform_3(%arg0: i32) -> (i32, i32) {
    %c0_i32 = arith.constant 0 : i32
    %c0_i32_0 = arith.constant 0 : i32
    %c0_i32_1 = arith.constant 0 : i32
    return %c0_i32, %c0_i32_0 : i32, i32
  }
  func.func @transform_4(%arg0: i32) -> (i32, i32) {
    %c0_i32 = arith.constant 0 : i32
    %c0_i32_0 = arith.constant 0 : i32
    %c0_i32_1 = arith.constant 0 : i32
    return %c0_i32, %c0_i32_0 : i32, i32
  }
  func.func @transform_5(%arg0: i32) -> (i32, i32) {
    %c0_i32 = arith.constant 0 : i32
    %c0_i32_0 = arith.constant 0 : i32
    %c0_i32_1 = arith.constant 0 : i32
    return %c0_i32, %c0_i32_0 : i32, i32
  }
  func.func @transform_6(%arg0: i32) -> (i32, i32) {
    %c0_i32 = arith.constant 0 : i32
    %c0_i32_0 = arith.constant 0 : i32
    %c0_i32_1 = arith.constant 0 : i32
    return %c0_i32, %c0_i32_0 : i32, i32
  }
  func.func @transform_7(%arg0: i32) -> (i32, i32) {
    %c0_i32 = arith.constant 0 : i32
    %c0_i32_0 = arith.constant 0 : i32
    return %arg0, %c0_i32 : i32, i32
  }
}

</mosaic_0001>

<bundles_post_ra>
// kernel: tpu_custom_call.1
= control target key start
LH: loop header
LB: loop body
LE: loop exit
PB: predicated region body
PF: predicated region fallthrough
CT: control target
= control target key end

     0   :  { %12 = vsyncpa [#allocation3], 0  ;;  %s2973_s0 = inlined_call_operand.vmem [shape: f32[256,784], index: 0, kind: input, shape index: {}]   ;;  %s2974_s1 = inlined_call_operand.vmem [shape: bf16[784,128], index: 1, kind: input, shape index: {}]   ;;  %s2975_s2 = inlined_call_operand.vmem [shape: f32[1,128], index: 2, kind: input, shape index: {}]   ;;  %s2976_s3 = inlined_call_operand.vmem [shape: bf16[128,128], index: 3, kind: input, shape index: {}]   ;;  %s2977_s4 = inlined_call_operand.vmem [shape: f32[1,128], index: 4, kind: input, shape index: {}]   ;;  %s2978_s5 = inlined_call_operand.vmem [shape: bf16[128,128], index: 5, kind: input, shape index: {}]   ;;  %s2979_s6 = inlined_call_operand.vmem [shape: f32[1,128], index: 6, kind: input, shape index: {}]   ;;  %s2980_s7 = inlined_call_operand.hbm [shape: f32[256,128], index: 7, kind: output, shape index: {}]  }
   0x1   :  { %14 = vsyncpa [#allocation3 + $0x1], 0  ;;  %s2337_s24 = smov 0   ;;  %s2339_s25 = smov 0  }
   0x2   :  { %s2341_s26 = smov 0   ;;  %s2343_s27 = smov 0  }
   0x3 LB: > { %s2358_s28 = sadd.s32 4294967295, %s2293_s27   ;;  %s1752_s29 = sadd.s32 4294967294, %s2293_s27   ;;  %s2293_s27 = sphi %s2343_s27, %s2986_s27   ;;  %s2289_s26 = sphi %s2341_s26, %s2985_s26   ;;  %s2285_s25 = sphi %s2339_s25, %s2984_s25   ;;  %s2281_s24 = sphi %s2337_s24, %s2983_s24  }
   0x4   : > { %s2362_s30 = sadd.s32 1, %s2293_s27   ;;  %s179_s8 = sadd.s32 1, %s2289_s26 }
   0x5   : > { %s176_s9 = ssub.s32 %s2293_s27, %s2362_s30  ;;  %p189_p0 = scmp.ne.s32.totalorder %s2289_s26, %s2285_s25 }
   0x6   : > { %p177_p1 = scmp.eq.s32.totalorder %s176_s9, 0  ;;  %p190_p2 = scmp.eq.s32.totalorder %s2358_s28, 1 }
   0x7   : > { %p195_p3 = scmp.ne.s32.totalorder %s2285_s25, %s2281_s24  ;;  %p196_p4 = scmp.eq.s32.totalorder %s1752_s29, 1 }
   0x8   : > { %s2373_s10 = scalar_select %p177_p1, %s2289_s26, %s179_s8  }
   0x9   : > { %p2375_p5 = por %p190_p2, %p189_p0  ;;  %p2379_p6 = por %p196_p4, %p195_p3 }
   0xa   : > { %p1755_p7 = scmp.ge.s32.totalorder %s2293_s27, 1  ;;  %p242_p8 = scmp.lt.s32.totalorder %s2293_s27, 3 }
   0xc   : > { %p243_p9 = pnand %p1755_p7, %p242_p8 }
   0xd   : > { %s1757_s19 = sshll.u32 (!%p243_p9), %s2358_s28, 4  ;;  %s272_s21 = sand.u32 (!%p243_p9), 1, %s2285_s25  }
   0xe   : > { %246 = sbr.rel (%p243_p9) target bundleno = 1009 (0x3f1), region = 48  ;;  %p276_p10 = scmp.lt.s32.totalorder (!%p243_p9), %s1757_s19, 31 }
   0xf   : > { %s1756_s22 = sshll.u32 (!%p243_p9), %s272_s21, 7  ;;  %s2097_s29 = sshll.u32 (!%p243_p9), %s2358_s28, 7 }
  0x10   : > { %s2906_s23 = scalar_lea.vmem (!%p243_p9), [#allocation2], %s1756_s22  ;;  %s1686_s13 = scalar_lea.hbm (!%p243_p9), %s2980_s7, %s2097_s29 }
  0x11   : > { %s1687_s14 = sshll.u32 (!%p243_p9), %s2906_s23, 4  ;;  %s1675_s28 = scalar_lea.sflag (!%p243_p9), [#allocation3], %s272_s21  ;;  %s1688_s14 = int_to_ptr.vmem [resolvable:$true] %s1687_s14 }
  0x12   : > { %s2251_s20 = scalar_lea.hbm (!%p243_p9), %s2980_s7, 256 }
  0x13   : > { %v2039_v0 = vld [vmem:[%s2974_s1 + $0x38] sm:$0xff]  ;;  %v2038_v1 = vld [vmem:[%s2974_s1 + $0x30] sm:$0xff]  ;;  %v2037_v2 = vld [vmem:[%s2974_s1 + $0x28] sm:$0xff]  ;;  %s2988_s19 = smov (!%p276_p10, %s1757_s19), 31  ;;  %vm848_vm0 = vcmask 130048  }
  0x14   : > { %2098 = vmatpush.bf16.msra.mxu1 %v2039_v0  ;;  %2099 = vmatpush.bf16.msra.mxu2 %v2039_v0  ;;  %v2036_v3 = vld [vmem:[%s2974_s1 + $0x20] sm:$0xff]  ;;  %v2035_v4 = vld [vmem:[%s2974_s1 + $0x18] sm:$0xff]  ;;  %v2034_v5 = vld [vmem:[%s2974_s1 + $0x10] sm:$0xff]  ;;  %s2122_s9 = smul.u32 56, %s2988_s19 }
  0x15   : > { %2100 = vmatpush.bf16.msra.mxu3 %v2039_v0  ;;  %873 = vmatpush.bf16.msra.mxu0 %v2039_v0  ;;  %v2033_v6 = vld [vmem:[%s2974_s1 + $0x8] sm:$0xff]  ;;  %v2032_v7 = vld [vmem:[%s2974_s1] sm:$0xff]  ;;  %v2055_v12 = vld [vmem:[%s2974_s1 + $0xb8] sm:$0xff] }
  0x16   : > { %s2410_s17 = scalar_lea.vmem %s2973_s0, %s2122_s9  ;;  %v2047_v15 = vld [vmem:[%s2974_s1 + $0x78] sm:$0xff]  ;;  %v2054_v22 = vld [vmem:[%s2974_s1 + $0xb0] sm:$0xff]  ;;  %v2053_v27 = vld [vmem:[%s2974_s1 + $0xa8] sm:$0xff] }
  0x17   : > { %v312_v8 = vld [vmem:[%s2410_s17 + $0xe0] sm:$0xff]  ;;  %v319_v9 = vld [vmem:[%s2410_s17 + $0x118] sm:$0xff]  ;;  %v2046_v24 = vld [vmem:[%s2974_s1 + $0x70] sm:$0xff] }
  0x18   : > { %2101 = vmatpush.bf16.msra.mxu1 %v2038_v1  ;;  %2102 = vmatpush.bf16.msra.mxu2 %v2038_v1  ;;  %v340_v10 = vld [vmem:[%s2410_s17 + $0x1c0] sm:$0xff]  ;;  %v347_v11 = vld [vmem:[%s2410_s17 + $0x1f8] sm:$0xff]  ;;  %v410_v17 = vpack.c.bf16 %v319_v9, %v312_v8  ;;  %v2062_v25 = vld [vmem:[%s2974_s1 + $0xf0] sm:$0xff] }
  0x19   : > { %2103 = vmatpush.bf16.msra.mxu3 %v2038_v1  ;;  %874 = vmatpush.bf16.msra.mxu0 %v2038_v1  ;;  %v368_v13 = vld [vmem:[%s2410_s17 + $0x2a0] sm:$0xff]  ;;  %v375_v14 = vld [vmem:[%s2410_s17 + $0x2d8] sm:$0xff]  ;;  %v424_v18 = vpack.c.bf16 %v347_v11, %v340_v10  ;;  %v2070_v28 = vld [vmem:[%s2974_s1 + $0x130] sm:$0xff] }
  0x1a   : > { %v2063_v16 = vld [vmem:[%s2974_s1 + $0xf8] sm:$0xff]  ;;  %v438_v19 = vpack.c.bf16 %v375_v14, %v368_v13  ;;  %v284_v20 = vld [vmem:[%s2410_s17] sm:$0xff]  ;;  %v2045_v29 = vld [vmem:[%s2974_s1 + $0x68] sm:$0xff] }
  0x1b   : > { %v291_v21 = vld [vmem:[%s2410_s17 + $0x38] sm:$0xff]  ;;  %v2061_v30 = vld [vmem:[%s2974_s1 + $0xe8] sm:$0xff]  ;;  %v2052_v31 = vld [vmem:[%s2974_s1 + $0xa0] sm:$0xff] }
  0x1c   : > { %2104 = vmatpush.bf16.msra.mxu1 %v2037_v2  ;;  %2105 = vmatpush.bf16.msra.mxu2 %v2037_v2  ;;  %v2071_v23 = vld [vmem:[%s2974_s1 + $0x138] sm:$0xff]  ;;  %v396_v26 = vpack.c.bf16 %v291_v21, %v284_v20  ;;  %v2069_v32 = vld [vmem:[%s2974_s1 + $0x128] sm:$0xff]  ;;  %v2044_v33 = vld [vmem:[%s2974_s1 + $0x60] sm:$0xff] }
  0x1d   : > { %2106 = vmatpush.bf16.msra.mxu3 %v2037_v2  ;;  %875 = vmatpush.bf16.msra.mxu0 %v2037_v2  ;;  %v2060_v34 = vld [vmem:[%s2974_s1 + $0xe0] sm:$0xff]  ;;  %v326_v35 = vld [vmem:[%s2410_s17 + $0x150] sm:$0xff]  ;;  %v333_v36 = vld [vmem:[%s2410_s17 + $0x188] sm:$0xff] }
  0x1e   : > { %v354_v37 = vld [vmem:[%s2410_s17 + $0x230] sm:$0xff]  ;;  %v361_v38 = vld [vmem:[%s2410_s17 + $0x268] sm:$0xff]  ;;  %v2051_v39 = vld [vmem:[%s2974_s1 + $0x98] sm:$0xff]  ;;  %v417_v45 = vpack.c.bf16 %v333_v36, %v326_v35 }
  0x1f   : > { %v382_v40 = vld [vmem:[%s2410_s17 + $0x310] sm:$0xff]  ;;  %v389_v41 = vld [vmem:[%s2410_s17 + $0x348] sm:$0xff]  ;;  %v2068_v42 = vld [vmem:[%s2974_s1 + $0x120] sm:$0xff]  ;;  %v431_v46 = vpack.c.bf16 %v361_v38, %v354_v37 }
  0x20   : > { %2107 = vmatpush.bf16.msra.mxu1 %v2036_v3  ;;  %2108 = vmatpush.bf16.msra.mxu2 %v2036_v3  ;;  %v2043_v43 = vld [vmem:[%s2974_s1 + $0x58] sm:$0xff]  ;;  %v445_v47 = vpack.c.bf16 %v389_v41, %v382_v40  ;;  %v298_v48 = vld [vmem:[%s2410_s17 + $0x70] sm:$0xff]  ;;  %v305_v49 = vld [vmem:[%s2410_s17 + $0xa8] sm:$0xff] }
  0x21   : > { %2109 = vmatpush.bf16.msra.mxu3 %v2036_v3  ;;  %876 = vmatpush.bf16.msra.mxu0 %v2036_v3  ;;  %v2059_v44 = vld [vmem:[%s2974_s1 + $0xd8] sm:$0xff]  ;;  %v2050_v50 = vld [vmem:[%s2974_s1 + $0x90] sm:$0xff]  ;;  %v403_v54 = vpack.c.bf16 %v305_v49, %v298_v48  ;;  %v2049_v55 = vld [vmem:[%s2974_s1 + $0x88] sm:$0xff] }
  0x22   : > { %v2067_v51 = vld [vmem:[%s2974_s1 + $0x118] sm:$0xff]  ;;  %v2042_v52 = vld [vmem:[%s2974_s1 + $0x50] sm:$0xff]  ;;  %v2041_v57 = vld [vmem:[%s2974_s1 + $0x48] sm:$0xff] }
  0x23   : > { %v2058_v53 = vld [vmem:[%s2974_s1 + $0xd0] sm:$0xff]  ;;  %v2057_v58 = vld [vmem:[%s2974_s1 + $0xc8] sm:$0xff]  ;;  %v2048_v59 = vld [vmem:[%s2974_s1 + $0x80] sm:$0xff] }
  0x24   : > { %2110 = vmatpush.bf16.msra.mxu1 %v2035_v4  ;;  %2111 = vmatpush.bf16.msra.mxu2 %v2035_v4  ;;  %v2066_v56 = vld [vmem:[%s2974_s1 + $0x110] sm:$0xff]  ;;  %v2065_v60 = vld [vmem:[%s2974_s1 + $0x108] sm:$0xff]  ;;  %v2040_v61 = vld [vmem:[%s2974_s1 + $0x40] sm:$0xff] }
  0x25   : > { %2112 = vmatpush.bf16.msra.mxu3 %v2035_v4  ;;  %877 = vmatpush.bf16.msra.mxu0 %v2035_v4  ;;  %v2056_v62 = vld [vmem:[%s2974_s1 + $0xc0] sm:$0xff]  ;;  %v285_v63 = vld [vmem:[%s2410_s17 + $0x8] sm:$0xff]  ;;  %v2079_v1 = vld [vmem:[%s2974_s1 + $0x178] sm:$0xff] }
  0x26   : > { %v2080_v0 = vld [vmem:[%s2974_s1 + $0x180] sm:$0xff]  ;;  %v286_v3 = vld [vmem:[%s2410_s17 + $0x10] sm:$0xff]  ;;  %v293_v4 = vld [vmem:[%s2410_s17 + $0x48] sm:$0xff] }
  0x27   : > { %v292_v2 = vld [vmem:[%s2410_s17 + $0x40] sm:$0xff]  ;;  %v398_v9 = vpack.c.bf16 %v293_v4, %v286_v3  ;;  %v2078_v13 = vld [vmem:[%s2974_s1 + $0x170] sm:$0xff]  ;;  %v301_v20 = vld [vmem:[%s2410_s17 + $0x88] sm:$0xff] }
  0x28   : > { %2113 = vmatpush.bf16.msra.mxu1 %v2034_v5  ;;  %2114 = vmatpush.bf16.msra.mxu2 %v2034_v5  ;;  %v397_v8 = vpack.c.bf16 %v292_v2, %v285_v63  ;;  %v288_v11 = vld [vmem:[%s2410_s17 + $0x20] sm:$0xff]  ;;  %v2075_v41 = vld [vmem:[%s2974_s1 + $0x158] sm:$0xff]  ;;  %v2073_v3 = vld [vmem:[%s2974_s1 + $0x148] sm:$0xff] }
  0x29   : > { %2115 = vmatpush.bf16.msra.mxu3 %v2034_v5  ;;  %878 = vmatpush.bf16.msra.mxu0 %v2034_v5  ;;  %v287_v5 = vld [vmem:[%s2410_s17 + $0x18] sm:$0xff]  ;;  %v308_v21 = vld [vmem:[%s2410_s17 + $0xc0] sm:$0xff] }
  0x2a   : > { %v316_v38 = vld [vmem:[%s2410_s17 + $0x100] sm:$0xff]  ;;  %v355_v4 = vld [vmem:[%s2410_s17 + $0x238] sm:$0xff] }
  0x2c   : > { %2116 = vmatpush.bf16.msra.mxu1 %v2033_v6  ;;  %2117 = vmatpush.bf16.msra.mxu2 %v2033_v6 }
  0x2d   : > { %2118 = vmatpush.bf16.msra.mxu3 %v2033_v6  ;;  %879 = vmatpush.bf16.msra.mxu0 %v2033_v6  ;;  %v294_v6 = vld [vmem:[%s2410_s17 + $0x50] sm:$0xff] }
  0x2e   : > { %v399_v10 = vpack.c.bf16 %v294_v6, %v287_v5  ;;  %v362_v5 = vld [vmem:[%s2410_s17 + $0x270] sm:$0xff]  ;;  %v356_v6 = vld [vmem:[%s2410_s17 + $0x240] sm:$0xff] }
  0x30   : > { %2119 = vmatpush.bf16.msra.mxu1 %v2032_v7  ;;  %2120 = vmatpush.bf16.msra.mxu2 %v2032_v7 }
  0x31   : > { %2121 = vmatpush.bf16.msra.mxu3 %v2032_v7  ;;  %880 = vmatpush.bf16.msra.mxu0 %v2032_v7  ;;  %v2064_v7 = vld [vmem:[%s2974_s1 + $0x100] sm:$0xff] }
  0x33   : > { %891 = vmatmul.bf16.vlgmr.msra.gmra.mxu1 %v410_v17  ;;  %901 = vmatmul.bf16.vlgmr.msra.gmra.mxu2 %v424_v18  ;;  %v306_v17 = vld [vmem:[%s2410_s17 + $0xb0] sm:$0xff]  ;;  %v300_v18 = vld [vmem:[%s2410_s17 + $0x80] sm:$0xff] }
  0x34   : > { %971 = vmatpush.bf16.msrb.mxu2 %v2055_v12  ;;  %922 = vmatpush.bf16.msrb.mxu1 %v2047_v15  ;;  %v295_v12 = vld [vmem:[%s2410_s17 + $0x58] sm:$0xff]  ;;  %v2077_v15 = vld [vmem:[%s2974_s1 + $0x168] sm:$0xff] }
  0x35   : > { %1020 = vmatpush.bf16.msrb.mxu3 %v2063_v16  ;;  %1069 = vmatpush.bf16.msrb.mxu0 %v2071_v23  ;;  %v400_v14 = vpack.c.bf16 %v295_v12, %v288_v11  ;;  %v299_v16 = vld [vmem:[%s2410_s17 + $0x78] sm:$0xff] }
  0x36   : > { %911 = vmatmul.bf16.vlgmr.msra.gmra.mxu3 %v438_v19  ;;  %881 = vmatmul.bf16.vlgmr.msra.gmra.mxu0 %v396_v26  ;;  %v307_v19 = vld [vmem:[%s2410_s17 + $0xb8] sm:$0xff]  ;;  %v309_v26 = vld [vmem:[%s2410_s17 + $0xc8] sm:$0xff] }
  0x37   : > { %v405_v23 = vpack.c.bf16 %v307_v19, %v300_v18  ;;  %v376_v18 = vld [vmem:[%s2410_s17 + $0x2e0] sm:$0xff]  ;;  %v370_v19 = vld [vmem:[%s2410_s17 + $0x2b0] sm:$0xff] }
  0x38   : > { %972 = vmatpush.bf16.msrb.mxu2 %v2054_v22  ;;  %923 = vmatpush.bf16.msrb.mxu1 %v2046_v24  ;;  %v404_v22 = vpack.c.bf16 %v306_v17, %v299_v16  ;;  %v406_v24 = vpack.c.bf16 %v308_v21, %v301_v20  ;;  %v2072_v16 = vld [vmem:[%s2974_s1 + $0x140] sm:$0xff]  ;;  %v369_v17 = vld [vmem:[%s2410_s17 + $0x2a8] sm:$0xff]  ;;  %v371_v21 = vld [vmem:[%s2410_s17 + $0x2b8] sm:$0xff] }
  0x39   : > { %1021 = vmatpush.bf16.msrb.mxu3 %v2062_v25  ;;  %1070 = vmatpush.bf16.msrb.mxu0 %v2070_v28  ;;  %v302_v25 = vld [vmem:[%s2410_s17 + $0x90] sm:$0xff]  ;;  %v2076_v28 = vld [vmem:[%s2974_s1 + $0x160] sm:$0xff]  ;;  %v377_v20 = vld [vmem:[%s2410_s17 + $0x2e8] sm:$0xff] }
  0x3c   : > { %973 = vmatpush.bf16.msrb.mxu2 %v2053_v27  ;;  %924 = vmatpush.bf16.msrb.mxu1 %v2045_v29  ;;  %v407_v27 = vpack.c.bf16 %v309_v26, %v302_v25  ;;  %v313_v29 = vld [vmem:[%s2410_s17 + $0xe8] sm:$0xff] }
  0x3d   : > { %1022 = vmatpush.bf16.msrb.mxu3 %v2061_v30  ;;  %1071 = vmatpush.bf16.msrb.mxu0 %v2069_v32  ;;  %v320_v30 = vld [vmem:[%s2410_s17 + $0x120] sm:$0xff]  ;;  %v321_v32 = vld [vmem:[%s2410_s17 + $0x128] sm:$0xff] }
  0x3e   : > { %v411_v35 = vpack.c.bf16 %v320_v30, %v313_v29  ;;  %v2615_v30 = vld [vmem:[%s2975_s2] ss:$0 sm:$0xff] }
  0x40   : > { %974 = vmatpush.bf16.msrb.mxu2 %v2052_v31  ;;  %925 = vmatpush.bf16.msrb.mxu1 %v2044_v33  ;;  %v314_v31 = vld [vmem:[%s2410_s17 + $0xf0] sm:$0xff]  ;;  %v315_v33 = vld [vmem:[%s2410_s17 + $0xf8] sm:$0xff] }
  0x41   : > { %1023 = vmatpush.bf16.msrb.mxu3 %v2060_v34  ;;  %1072 = vmatpush.bf16.msrb.mxu0 %v2068_v42  ;;  %v322_v34 = vld [vmem:[%s2410_s17 + $0x130] sm:$0xff]  ;;  %v412_v36 = vpack.c.bf16 %v321_v32, %v314_v31  ;;  %v327_v42 = vld [vmem:[%s2410_s17 + $0x158] sm:$0xff] }
  0x42   : > { %v413_v37 = vpack.c.bf16 %v322_v34, %v315_v33 }
  0x43   : > { %896 = vmatmul.bf16.gmra.mxu1 %v417_v45  ;;  %906 = vmatmul.bf16.gmra.mxu2 %v431_v46  ;;  %v335_v45 = vld [vmem:[%s2410_s17 + $0x198] sm:$0xff]  ;;  %v329_v46 = vld [vmem:[%s2410_s17 + $0x168] sm:$0xff] }
  0x44   : > { %975 = vmatpush.bf16.msrb.mxu2 %v2051_v39  ;;  %926 = vmatpush.bf16.msrb.mxu1 %v2043_v43  ;;  %v323_v39 = vld [vmem:[%s2410_s17 + $0x138] sm:$0xff]  ;;  %v334_v43 = vld [vmem:[%s2410_s17 + $0x190] sm:$0xff] }
  0x45   : > { %1024 = vmatpush.bf16.msrb.mxu3 %v2059_v44  ;;  %1073 = vmatpush.bf16.msrb.mxu0 %v2067_v51  ;;  %v414_v40 = vpack.c.bf16 %v323_v39, %v316_v38  ;;  %v328_v44 = vld [vmem:[%s2410_s17 + $0x160] sm:$0xff]  ;;  %v418_v48 = vpack.c.bf16 %v334_v43, %v327_v42  ;;  %v330_v51 = vld [vmem:[%s2410_s17 + $0x170] sm:$0xff]  ;;  %v391_v39 = vld [vmem:[%s2410_s17 + $0x358] sm:$0xff] }
  0x46   : > { %916 = vmatmul.bf16.gmra.mxu3 %v445_v47  ;;  %886 = vmatmul.bf16.gmra.mxu0 %v403_v54  ;;  %v336_v47 = vld [vmem:[%s2410_s17 + $0x1a0] sm:$0xff]  ;;  %v419_v49 = vpack.c.bf16 %v335_v45, %v328_v44  ;;  %v2074_v54 = vld [vmem:[%s2974_s1 + $0x150] sm:$0xff] }
  0x47   : > { %v384_v38 = vld [vmem:[%s2410_s17 + $0x320] sm:$0xff] }
  0x48   : > { %976 = vmatpush.bf16.msrb.mxu2 %v2050_v50  ;;  %927 = vmatpush.bf16.msrb.mxu1 %v2042_v52  ;;  %v420_v50 = vpack.c.bf16 %v336_v47, %v329_v46  ;;  %v337_v52 = vld [vmem:[%s2410_s17 + $0x1a8] sm:$0xff]  ;;  %v447_v46 = vpack.c.bf16 %v391_v39, %v384_v38  ;;  %v318_v38 = vld [vmem:[%s2410_s17 + $0x110] sm:$0xff] }
  0x49   : > { %1025 = vmatpush.bf16.msrb.mxu3 %v2058_v53  ;;  %1074 = vmatpush.bf16.msrb.mxu0 %v2066_v56  ;;  %v421_v53 = vpack.c.bf16 %v337_v52, %v330_v51  ;;  %v348_v56 = vld [vmem:[%s2410_s17 + $0x200] sm:$0xff]  ;;  %v2088_v52 = vld [vmem:[%s2976_s3 + $0x38] sm:$0xff]  ;;  %v325_v39 = vld [vmem:[%s2410_s17 + $0x148] sm:$0xff] }
  0x4c   : > { %977 = vmatpush.bf16.msrb.mxu2 %v2049_v55  ;;  %928 = vmatpush.bf16.msrb.mxu1 %v2041_v57  ;;  %v341_v55 = vld [vmem:[%s2410_s17 + $0x1c8] sm:$0xff]  ;;  %v342_v57 = vld [vmem:[%s2410_s17 + $0x1d0] sm:$0xff] }
  0x4d   : > { %1026 = vmatpush.bf16.msrb.mxu3 %v2057_v58  ;;  %1075 = vmatpush.bf16.msrb.mxu0 %v2065_v60  ;;  %v349_v58 = vld [vmem:[%s2410_s17 + $0x208] sm:$0xff]  ;;  %v350_v60 = vld [vmem:[%s2410_s17 + $0x210] sm:$0xff] }
  0x50   : > { %978 = vmatpush.bf16.msrb.mxu2 %v2048_v59  ;;  %929 = vmatpush.bf16.msrb.mxu1 %v2040_v61  ;;  %v343_v59 = vld [vmem:[%s2410_s17 + $0x1d8] sm:$0xff]  ;;  %v425_v61 = vpack.c.bf16 %v348_v56, %v341_v55 }
  0x51   : > { %1027 = vmatpush.bf16.msrb.mxu3 %v2056_v62  ;;  %1076 = vmatpush.bf16.msrb.mxu0 %v2064_v7  ;;  %v426_v62 = vpack.c.bf16 %v349_v58, %v342_v57  ;;  %v427_v63 = vpack.c.bf16 %v350_v60, %v343_v59  ;;  %v363_v7 = vld [vmem:[%s2410_s17 + $0x278] sm:$0xff]  ;;  %v289_v59 = vld [vmem:[%s2410_s17 + $0x28] sm:$0xff]  ;;  %v296_v60 = vld [vmem:[%s2410_s17 + $0x60] sm:$0xff] }
  0x52   : > { %v433_v11 = vpack.c.bf16 %v363_v7, %v356_v6  ;;  %v2087_v6 = vld [vmem:[%s2976_s3 + $0x30] sm:$0xff] }
  0x53   : > { %930 = vmatmul.bf16.vlgmr.msrb.gmra.mxu1 %v397_v8  ;;  %979 = vmatmul.bf16.vlgmr.msrb.gmra.mxu2 %v398_v9  ;;  %v357_v8 = vld [vmem:[%s2410_s17 + $0x248] sm:$0xff]  ;;  %v364_v9 = vld [vmem:[%s2410_s17 + $0x280] sm:$0xff] }
  0x54   : > { %1174 = vmatpush.bf16.msra.mxu2 %v2080_v0  ;;  %1118 = vmatpush.bf16.msra.mxu1 %v2079_v1  ;;  %v344_v0 = vld [vmem:[%s2410_s17 + $0x1e0] sm:$0xff]  ;;  %v351_v1 = vld [vmem:[%s2410_s17 + $0x218] sm:$0xff]  ;;  %v434_v12 = vpack.c.bf16 %v364_v9, %v357_v8 }
  0x55   : > { %v428_v2 = vpack.c.bf16 %v351_v1, %v344_v0  ;;  %1308 = vmatpush.bf16.msra.mxu3 %v2088_v52 }
  0x56   : > { %1028 = vmatmul.bf16.vlgmr.msrb.gmra.mxu3 %v399_v10  ;;  %1077 = vmatmul.bf16.vlgmr.msrb.gmra.mxu0 %v400_v14  ;;  %v432_v10 = vpack.c.bf16 %v362_v5, %v355_v4  ;;  %v365_v14 = vld [vmem:[%s2410_s17 + $0x288] sm:$0xff] }
  0x58   : > { %1119 = vmatpush.bf16.msra.mxu1 %v2078_v13  ;;  %v358_v13 = vld [vmem:[%s2410_s17 + $0x250] sm:$0xff] }
  0x59   : > { %1309 = vmatpush.bf16.msra.mxu3 %v2087_v6  ;;  %v2084_v6 = vld [vmem:[%s2976_s3 + $0x18] sm:$0xff] }
  0x5c   : > { %1120 = vmatpush.bf16.msra.mxu1 %v2077_v15  ;;  %v435_v15 = vpack.c.bf16 %v365_v14, %v358_v13  ;;  %v310_v13 = vld [vmem:[%s2410_s17 + $0xd0] sm:$0xff]  ;;  %v304_v14 = vld [vmem:[%s2410_s17 + $0xa0] sm:$0xff] }
  0x60   : > { %1121 = vmatpush.bf16.msra.mxu1 %v2076_v28  ;;  %v379_v28 = vld [vmem:[%s2410_s17 + $0x2f8] sm:$0xff] }
  0x63   : > { %935 = vmatmul.bf16.gmra.mxu1 %v404_v22  ;;  %984 = vmatmul.bf16.gmra.mxu2 %v405_v23  ;;  %v378_v22 = vld [vmem:[%s2410_s17 + $0x2f0] sm:$0xff]  ;;  %v439_v23 = vpack.c.bf16 %v376_v18, %v369_v17 }
  0x64   : > { %1122 = vmatpush.bf16.msra.mxu1 %v2075_v41  ;;  %v441_v26 = vpack.c.bf16 %v378_v22, %v371_v21  ;;  %v392_v41 = vld [vmem:[%s2410_s17 + $0x360] sm:$0xff] }
  0x66   : > { %1033 = vmatmul.bf16.gmra.mxu3 %v406_v24  ;;  %1082 = vmatmul.bf16.gmra.mxu0 %v407_v27  ;;  %v440_v24 = vpack.c.bf16 %v377_v20, %v370_v19  ;;  %v372_v27 = vld [vmem:[%s2410_s17 + $0x2c0] sm:$0xff] }
  0x67   : > { %v442_v29 = vpack.c.bf16 %v379_v28, %v372_v27 }
  0x68   : > { %1123 = vmatpush.bf16.msra.mxu1 %v2074_v54 }
  0x6c   : > { %1124 = vmatpush.bf16.msra.mxu1 %v2073_v3 }
  0x70   : > { %1125 = vmatpush.bf16.msra.mxu1 %v2072_v16 }
  0x73   : > { %940 = vmatmul.bf16.gmra.mxu1 %v411_v35  ;;  %989 = vmatmul.bf16.gmra.mxu2 %v412_v36  ;;  %v383_v36 = vld [vmem:[%s2410_s17 + $0x318] sm:$0xff] }
  0x76   : > { %1038 = vmatmul.bf16.gmra.mxu3 %v413_v37  ;;  %1087 = vmatmul.bf16.gmra.mxu0 %v414_v40  ;;  %v390_v37 = vld [vmem:[%s2410_s17 + $0x350] sm:$0xff]  ;;  %v385_v40 = vld [vmem:[%s2410_s17 + $0x328] sm:$0xff] }
  0x77   : > { %v446_v45 = vpack.c.bf16 %v390_v37, %v383_v36  ;;  %v317_v36 = vld [vmem:[%s2410_s17 + $0x108] sm:$0xff]  ;;  %v324_v37 = vld [vmem:[%s2410_s17 + $0x140] sm:$0xff] }
  0x83   : > { %945 = vmatmul.bf16.gmra.mxu1 %v418_v48  ;;  %994 = vmatmul.bf16.gmra.mxu2 %v419_v49  ;;  %v448_v48 = vpack.c.bf16 %v392_v41, %v385_v40  ;;  %v386_v49 = vld [vmem:[%s2410_s17 + $0x330] sm:$0xff] }
  0x86   : > { %1043 = vmatmul.bf16.gmra.mxu3 %v420_v50  ;;  %1092 = vmatmul.bf16.gmra.mxu0 %v421_v53  ;;  %v393_v50 = vld [vmem:[%s2410_s17 + $0x368] sm:$0xff] }
  0x87   : > { %v449_v51 = vpack.c.bf16 %v393_v50, %v386_v49 }
  0x93   : > { %950 = vmatmul.bf16.gmra.mxu1 %v425_v61  ;;  %999 = vmatmul.bf16.gmra.mxu2 %v426_v62  ;;  %v290_v61 = vld [vmem:[%s2410_s17 + $0x30] sm:$0xff]  ;;  %v297_v62 = vld [vmem:[%s2410_s17 + $0x68] sm:$0xff] }
  0x94   : > { %v402_v3 = vpack.c.bf16 %v297_v62, %v290_v61  ;;  %v332_v61 = vld [vmem:[%s2410_s17 + $0x180] sm:$0xff]  ;;  %v339_v62 = vld [vmem:[%s2410_s17 + $0x1b8] sm:$0xff] }
  0x96   : > { %1048 = vmatmul.bf16.gmra.mxu3 %v427_v63  ;;  %1097 = vmatmul.bf16.gmra.mxu0 %v428_v2  ;;  %v401_v2 = vpack.c.bf16 %v296_v60, %v289_v59  ;;  %v331_v59 = vld [vmem:[%s2410_s17 + $0x178] sm:$0xff]  ;;  %v338_v60 = vld [vmem:[%s2410_s17 + $0x1b0] sm:$0xff] }
  0xa3   : > { %955 = vmatmul.bf16.gmra.mxu1 %v432_v10  ;;  %1004 = vmatmul.bf16.gmra.mxu2 %v433_v11 }
  0xa6   : > { %1053 = vmatmul.bf16.gmra.mxu3 %v434_v12  ;;  %1102 = vmatmul.bf16.gmra.mxu0 %v435_v15  ;;  %v303_v12 = vld [vmem:[%s2410_s17 + $0x98] sm:$0xff] }
  0xa7   : > { %v311_v15 = vld [vmem:[%s2410_s17 + $0xd8] sm:$0xff]  ;;  %v408_v21 = vpack.c.bf16 %v310_v13, %v303_v12  ;;  %v345_v12 = vld [vmem:[%s2410_s17 + $0x1e8] sm:$0xff]  ;;  %v352_v13 = vld [vmem:[%s2410_s17 + $0x220] sm:$0xff] }
  0xa8   : > { %v409_v22 = vpack.c.bf16 %v311_v15, %v304_v14  ;;  %v346_v14 = vld [vmem:[%s2410_s17 + $0x1f0] sm:$0xff]  ;;  %v353_v15 = vld [vmem:[%s2410_s17 + $0x228] sm:$0xff] }
  0xb0   : > { %v2608_v25 = vpop.f32.mrf.mxu1 }
  0xb3   : > { %960 = vmatmul.bf16.gmra.mxu1 %v439_v23  ;;  %1009 = vmatmul.bf16.gmra.mxu2 %v440_v24  ;;  %v882_v58 = vpop.f32.mrf.mxu0 }
  0xb4   : > { %v883_v0 = vadd.f32 %v2615_v30, %v882_v58 }
  0xb6   : > { %1058 = vmatmul.bf16.gmra.mxu3 %v441_v26  ;;  %v902_v31 = vpop.f32.mrf.mxu2  ;;  %1107 = vmatmul.bf16.gmra.mxu0 %v442_v29  ;;  %v2086_v26 = vld [vmem:[%s2976_s3 + $0x28] sm:$0xff] }
  0xb7   : > { %v2618_v32 = vadd.f32 %v2615_v30, %v902_v31  ;;  %1310 = vmatpush.bf16.msra.mxu3 %v2086_v26 }
  0xb8   : > { %v2620_v34 = vpop.f32.mrf.mxu1 }
  0xb9   : > { %v912_v33 = vpop.f32.mrf.mxu3 }
  0xba   : > { %v2623_v35 = vadd.f32 %v2615_v30, %v912_v33 }
  0xbb   : > { %v884_v7 = vpop.f32.mrf.mxu0 }
  0xbc   : > { %v885_v11 = vadd.f32 %v2615_v30, %v884_v7 }
  0xbe   : > { %v904_v42 = vpop.f32.mrf.mxu2 }
  0xbf   : > { %v2632_v43 = vadd.f32 %v2615_v30, %v904_v42  ;;  %v893_v42 = vadd.f32 %v2615_v30, %v2608_v25  ;;  %v895_v25 = vadd.f32 %v2615_v30, %v2620_v34  ;;  %v423_v34 = vpack.c.bf16 %v339_v62, %v332_v61 }
  0xc0   : > { %v2636_v47 = vpop.f32.mrf.mxu1 }
  0xc1   : > { %v2634_v44 = vpop.f32.mrf.mxu3 }
  0xc3   : > { %965 = vmatmul.bf16.gmra.mxu1 %v446_v45  ;;  %1014 = vmatmul.bf16.gmra.mxu2 %v447_v46  ;;  %v887_v17 = vpop.f32.mrf.mxu0  ;;  %v415_v46 = vpack.c.bf16 %v324_v37, %v317_v36  ;;  %v367_v36 = vld [vmem:[%s2410_s17 + $0x298] sm:$0xff] }
  0xc4   : > { %v888_v19 = vadd.f32 %v2615_v30, %v887_v17 }
  0xc6   : > { %1063 = vmatmul.bf16.gmra.mxu3 %v448_v48  ;;  %v907_v53 = vpop.f32.mrf.mxu2  ;;  %1112 = vmatmul.bf16.gmra.mxu0 %v449_v51  ;;  %v416_v48 = vpack.c.bf16 %v325_v39, %v318_v38  ;;  %v2085_v51 = vld [vmem:[%s2976_s3 + $0x20] sm:$0xff] }
  0xc7   : > { %v2644_v54 = vadd.f32 %v2615_v30, %v907_v53  ;;  %1311 = vmatpush.bf16.msra.mxu3 %v2085_v51  ;;  %v373_v51 = vld [vmem:[%s2410_s17 + $0x2c8] sm:$0xff] }
  0xc8   : > { %v2646_v56 = vpop.f32.mrf.mxu1 }
  0xc9   : > { %v917_v55 = vpop.f32.mrf.mxu3 }
  0xca   : > { %v2649_v57 = vadd.f32 %v2615_v30, %v917_v55 }
  0xcb   : > { %v889_v29 = vpop.f32.mrf.mxu0  ;;  %1312 = vmatpush.bf16.msra.mxu3 %v2084_v6 }
  0xcc   : > { %v890_v33 = vadd.f32 %v2615_v30, %v889_v29  ;;  %v359_v29 = vld [vmem:[%s2410_s17 + $0x258] sm:$0xff] }
  0xce   : > { %v909_v63 = vpop.f32.mrf.mxu2 }
  0xcf   : > { %v2657_v1 = vadd.f32 %v2615_v30, %v909_v63 }
  0xd0   : > { %v931_v4 = vpop.f32.mrf.mxu1 }
  0xd1   : > { %v932_v5 = vadd.f32 %v931_v4, %v883_v0  ;;  %v898_v0 = vadd.f32 %v2615_v30, %v2636_v47  ;;  %v900_v47 = vadd.f32 %v2615_v30, %v2646_v56 }
  0xd3   : > { %1126 = vmatmul.bf16.vlgmr.msra.gmra.mxu1 %v401_v2  ;;  %1955 = vmatmul.msk.bf16.vlgmr.msra.gmra.mxu2 %vm848_vm0, %v402_v3  ;;  %v422_v3 = vpack.c.bf16 %v338_v60, %v331_v59 }
  0xd6   : > { %v980_v8 = vpop.f32.mrf.mxu2 }
  0xd7   : > { %v2663_v9 = vadd.f32 %v980_v8, %v932_v5 }
  0xd8   : > { %v933_v10 = vpop.f32.mrf.mxu1 }
  0xd9   : > { %v934_v16 = vadd.f32 %v933_v10, %v885_v11 }
  0xde   : > { %v982_v18 = vpop.f32.mrf.mxu2 }
  0xdf   : > { %v2671_v20 = vadd.f32 %v982_v18, %v934_v16  ;;  %v429_v18 = vpack.c.bf16 %v352_v13, %v345_v12  ;;  %v395_v12 = vld [vmem:[%s2410_s17 + $0x378] sm:$0xff] }
  0xe0   : > { %v936_v23 = vpop.f32.mrf.mxu1 }
  0xe1   : > { %v937_v24 = vadd.f32 %v936_v23, %v888_v19  ;;  %v430_v19 = vpack.c.bf16 %v353_v15, %v346_v14 }
  0xe3   : > { %1131 = vmatmul.bf16.gmra.mxu1 %v408_v21  ;;  %1956 = vmatmul.msk.bf16.gmra.mxu2 %vm848_vm0, %v409_v22  ;;  %v2083_v22 = vld [vmem:[%s2976_s3 + $0x10] sm:$0xff] }
  0xe4   : > { %1313 = vmatpush.bf16.msra.mxu3 %v2083_v22 }
  0xe6   : > { %v985_v27 = vpop.f32.mrf.mxu2 }
  0xe7   : > { %v2677_v28 = vadd.f32 %v985_v27, %v937_v24 }
  0xe8   : > { %v938_v31 = vpop.f32.mrf.mxu1 }
  0xe9   : > { %v939_v40 = vadd.f32 %v938_v31, %v890_v33  ;;  %v366_v31 = vld [vmem:[%s2410_s17 + $0x290] sm:$0xff]  ;;  %v360_v33 = vld [vmem:[%s2410_s17 + $0x260] sm:$0xff] }
  0xea   : > { %v436_v38 = vpack.c.bf16 %v366_v31, %v359_v29  ;;  %v437_v39 = vpack.c.bf16 %v367_v36, %v360_v33 }
  0xee   : > { %v987_v41 = vpop.f32.mrf.mxu2 }
  0xef   : > { %v2686_v45 = vadd.f32 %v987_v41, %v939_v40 }
  0xf0   : > { %v941_v49 = vpop.f32.mrf.mxu1 }
  0xf1   : > { %v942_v50 = vadd.f32 %v941_v49, %v893_v42  ;;  %v919_v42 = vpop.f32.mrf.mxu3 }
  0xf2   : > { %v920_v22 = vadd.f32 %v2615_v30, %v919_v42 }
  0xf3   : > { %1136 = vmatmul.bf16.gmra.mxu1 %v415_v46  ;;  %1957 = vmatmul.msk.bf16.gmra.mxu2 %vm848_vm0, %v416_v48 }
  0xf6   : > { %v990_v52 = vpop.f32.mrf.mxu2 }
  0xf7   : > { %v2694_v53 = vadd.f32 %v990_v52, %v942_v50  ;;  %v380_v52 = vld [vmem:[%s2410_s17 + $0x300] sm:$0xff] }
  0xf8   : > { %v943_v55 = vpop.f32.mrf.mxu1  ;;  %v443_v60 = vpack.c.bf16 %v380_v52, %v373_v51 }
  0xf9   : > { %v944_v58 = vadd.f32 %v943_v55, %v895_v25  ;;  %v374_v25 = vld [vmem:[%s2410_s17 + $0x2d0] sm:$0xff]  ;;  %v381_v55 = vld [vmem:[%s2410_s17 + $0x308] sm:$0xff] }
  0xfa   : > { %v444_v61 = vpack.c.bf16 %v381_v55, %v374_v25 }
  0xfe   : > { %v992_v63 = vpop.f32.mrf.mxu2 }
  0xff   : > { %v2702_v2 = vadd.f32 %v992_v63, %v944_v58 }
 0x100   : > { %v946_v4 = vpop.f32.mrf.mxu1 }
 0x101   : > { %v947_v5 = vadd.f32 %v946_v4, %v898_v0  ;;  %v1078_v0 = vpop.f32.mrf.mxu0 }
 0x103   : > { %1141 = vmatmul.bf16.gmra.mxu1 %v422_v3  ;;  %1958 = vmatmul.msk.bf16.gmra.mxu2 %vm848_vm0, %v423_v34  ;;  %v915_v34 = vadd.f32 %v2615_v30, %v2634_v44  ;;  %v2096_v30 = vld [vmem:[%s2978_s5 + $0x38] sm:$0xff] }
 0x104   : > { %1449 = vmatpush.bf16.msra.mxu0 %v2096_v30 }
 0x106   : > { %v995_v7 = vpop.f32.mrf.mxu2 }
 0x107   : > { %v2710_v8 = vadd.f32 %v995_v7, %v947_v5 }
 0x108   : > { %v948_v10 = vpop.f32.mrf.mxu1 }
 0x109   : > { %v949_v11 = vadd.f32 %v948_v10, %v900_v47  ;;  %v1080_v47 = vpop.f32.mrf.mxu0  ;;  %v394_v10 = vld [vmem:[%s2410_s17 + $0x370] sm:$0xff] }
 0x10e   : > { %v997_v16 = vpop.f32.mrf.mxu2 }
 0x10f   : > { %v2716_v17 = vadd.f32 %v997_v16, %v949_v11  ;;  %v388_v11 = vld [vmem:[%s2410_s17 + $0x340] sm:$0xff] }
 0x110   : > { %v951_v21 = vpop.f32.mrf.mxu1  ;;  %v451_v16 = vpack.c.bf16 %v395_v12, %v388_v11 }
 0x111   : > { %v952_v56 = vadd.f32 %v951_v21, %v2618_v32  ;;  %v1083_v44 = vpop.f32.mrf.mxu0 }
 0x113   : > { %1146 = vmatmul.bf16.gmra.mxu1 %v429_v18  ;;  %1959 = vmatmul.msk.bf16.gmra.mxu2 %vm848_vm0, %v430_v19 }
 0x116   : > { %v1000_v23 = vpop.f32.mrf.mxu2 }
 0x117   : > { %v2723_v24 = vadd.f32 %v1000_v23, %v952_v56 }
 0x118   : > { %v953_v26 = vpop.f32.mrf.mxu1 }
 0x119   : > { %v954_v27 = vadd.f32 %v953_v26, %v2632_v43  ;;  %v2082_v43 = vld [vmem:[%s2976_s3 + $0x8] sm:$0xff]  ;;  %v1085_v36 = vpop.f32.mrf.mxu0 }
 0x11a   : > { %1314 = vmatpush.bf16.msra.mxu3 %v2082_v43 }
 0x11e   : > { %v1002_v32 = vpop.f32.mrf.mxu2 }
 0x11f   : > { %v2730_v37 = vadd.f32 %v1002_v32, %v954_v27 }
 0x120   : > { %v956_v40 = vpop.f32.mrf.mxu1 }
 0x121   : > { %v957_v41 = vadd.f32 %v956_v40, %v2644_v54  ;;  %v1029_v54 = vpop.f32.mrf.mxu3  ;;  %v1088_v42 = vpop.f32.mrf.mxu0 }
 0x123   : > { %1151 = vmatmul.bf16.gmra.mxu1 %v436_v38  ;;  %1960 = vmatmul.msk.bf16.gmra.mxu2 %vm848_vm0, %v437_v39 }
 0x126   : > { %v1005_v46 = vpop.f32.mrf.mxu2 }
 0x127   : > { %v2737_v48 = vadd.f32 %v1005_v46, %v957_v41 }
 0x128   : > { %v958_v49 = vpop.f32.mrf.mxu1 }
 0x129   : > { %v959_v50 = vadd.f32 %v958_v49, %v2657_v1  ;;  %v2081_v1 = vld [vmem:[%s2976_s3] sm:$0xff]  ;;  %v1031_v5 = vpop.f32.mrf.mxu3 }
 0x12a   : > { %1315 = vmatpush.bf16.msra.mxu3 %v2081_v1  ;;  %v1032_v40 = vadd.f32 %v1031_v5, %v2671_v20  ;;  %v1090_v20 = vpop.f32.mrf.mxu0 }
 0x12c   : > { %v1081_v46 = vadd.f32 %v1080_v47, %v1032_v40 }
 0x12e   : > { %v1007_v58 = vpop.f32.mrf.mxu2 }
 0x12f   : > { %v2744_v59 = vadd.f32 %v1007_v58, %v959_v50 }
 0x130   : > { %v961_v62 = vpop.f32.mrf.mxu1 }
 0x131   : > { %v962_v63 = vadd.f32 %v961_v62, %v2623_v35  ;;  %v387_v35 = vld [vmem:[%s2410_s17 + $0x338] sm:$0xff]  ;;  %v1034_v21 = vpop.f32.mrf.mxu3  ;;  %s1689_s17 = sshll.u32 %s1686_s13, 4  ;;  %s1690_s17 = int_to_ptr.hbm [resolvable:$true] %s1689_s17 }
 0x132   : > { %v450_v15 = vpack.c.bf16 %v394_v10, %v387_v35  ;;  %v1093_v47 = vpop.f32.mrf.mxu0  ;;  %s2245_s15 = sshra.s32 %s1690_s17, 4  ;;  %s2246_s15 = int_to_ptr.hbm [resolvable:$true] %s2245_s15 }
 0x133   : > { %1156 = vmatmul.bf16.gmra.mxu1 %v443_v60  ;;  %1961 = vmatmul.msk.bf16.gmra.mxu2 %vm848_vm0, %v444_v61  ;;  %v1035_v61 = vadd.f32 %v1034_v21, %v2677_v28  ;;  %s2247_s16 = scalar_lea.hbm %s2246_s15, 128  ;;  %p2252_p0 = scmp.lt.s32.totalorder %s2246_s15, %s2980_s7 }
 0x134   : > { %p2248_p11 = scmp.ne.s32.totalorder %s2246_s15, %s2247_s16  ;;  %p2253_p1 = scmp.lt.s32.totalorder %s2251_s20, %s2247_s16 }
 0x135   : > { %v1084_v1 = vadd.f32 %v1083_v44, %v1035_v61 }
 0x136   : > { %v1010_v3 = vpop.f32.mrf.mxu2  ;;  %p2249_p12 = pnand %p2248_p11, %p2375_p5  ;;  %p2254_p2 = por %p2253_p1, %p2252_p0 }
 0x137   : > { %v2753_v4 = vadd.f32 %v1010_v3, %v962_v63  ;;  %v2095_v3 = vld [vmem:[%s2978_s5 + $0x30] sm:$0xff] }
 0x138   : > { %v963_v6 = vpop.f32.mrf.mxu1  ;;  %1450 = vmatpush.bf16.msra.mxu0 %v2095_v3  ;;  %p2250_p13 = pneg %p2249_p12 }
 0x139   : > { %v964_v7 = vadd.f32 %v963_v6, %v915_v34  ;;  %v1036_v29 = vpop.f32.mrf.mxu3 }
 0x13a   : > { %v1037_v63 = vadd.f32 %v1036_v29, %v2686_v45  ;;  %v1095_v21 = vpop.f32.mrf.mxu0  ;;  %p2255_p3 = pnand %p2254_p2, %p2250_p13 }
 0x13c   : > { %v1086_v5 = vadd.f32 %v1085_v36, %v1037_v63 }
 0x13e   : > { %v1012_v13 = vpop.f32.mrf.mxu2 }
 0x13f   : > { %v2759_v14 = vadd.f32 %v1012_v13, %v964_v7 }
 0x140   : > { %v966_v18 = vpop.f32.mrf.mxu1 }
 0x141   : > { %v967_v19 = vadd.f32 %v966_v18, %v2649_v57  ;;  %v1030_v57 = vadd.f32 %v1029_v54, %v2663_v9  ;;  %v1039_v38 = vpop.f32.mrf.mxu3 }
 0x142   : > { %v1098_v40 = vpop.f32.mrf.mxu0 }
 0x143   : > { %1161 = vmatmul.bf16.gmra.mxu1 %v450_v15  ;;  %1962 = vmatmul.msk.bf16.gmra.mxu2 %vm848_vm0, %v451_v16  ;;  %v1079_v43 = vadd.f32 %v1078_v0, %v1030_v57  ;;  %v1040_v16 = vadd.f32 %v1039_v38, %v2694_v53 }
 0x146   : > { %v1015_v56 = vpop.f32.mrf.mxu2 }
 0x147   : > { %v2764_v23 = vadd.f32 %v1015_v56, %v967_v19  ;;  %v1089_v56 = vadd.f32 %v1088_v42, %v1040_v16 }
 0x148   : > { %v968_v26 = vpop.f32.mrf.mxu1 }
 0x149   : > { %v969_v27 = vadd.f32 %v968_v26, %v920_v22  ;;  %v1041_v55 = vpop.f32.mrf.mxu3  ;;  %v2094_v22 = vld [vmem:[%s2978_s5 + $0x28] sm:$0xff] }
 0x14a   : > { %v1042_v19 = vadd.f32 %v1041_v55, %v2702_v2  ;;  %1451 = vmatpush.bf16.msra.mxu0 %v2094_v22 }
 0x14c   : > { %v1091_v26 = vadd.f32 %v1090_v20, %v1042_v19 }
 0x14e   : > { %v1017_v31 = vpop.f32.mrf.mxu2 }
 0x14f   : > { %v2766_v33 = vadd.f32 %v1017_v31, %v969_v27 }
 0x150   : > { %v1127_v32 = vpop.f32.mrf.mxu1 }
 0x151   : > { %v1128_v49 = vadd.f32 %v1127_v32, %v1079_v43  ;;  %v1044_v34 = vpop.f32.mrf.mxu3 }
 0x156   : > { %v1176_v39 = vpop.f32.mrf.mxu2 }
 0x157   : > { %v1177_v50 = vadd.f32 %v1176_v39, %v1128_v49 }
 0x158   : > { %v1129_v41 = vpop.f32.mrf.mxu1 }
 0x159   : > { %v1130_v51 = vadd.f32 %v1129_v41, %v1081_v46  ;;  %v1216_v54 = vmax.f32 %v1177_v50, 0.0  ;;  %v1046_v45 = vpop.f32.mrf.mxu3  ;;  %v1045_v41 = vadd.f32 %v1044_v34, %v2710_v8  ;;  %v2093_v50 = vld [vmem:[%s2978_s5 + $0x20] sm:$0xff] }
 0x15a   : > { %v1047_v30 = vadd.f32 %v1046_v45, %v2716_v17  ;;  %1452 = vmatpush.bf16.msra.mxu0 %v2093_v50 }
 0x15b   : > { %v1094_v49 = vadd.f32 %v1093_v47, %v1045_v41 }
 0x15e   : > { %v1178_v52 = vpop.f32.mrf.mxu2 }
 0x15f   : > { %v1179_v25 = vadd.f32 %v1178_v52, %v1130_v51  ;;  %v1096_v51 = vadd.f32 %v1095_v21, %v1047_v30  ;;  %v2089_v30 = vld [vmem:[%s2978_s5] sm:$0xff] }
 0x160   : > { %v1132_v9 = vpop.f32.mrf.mxu1 }
 0x161   : > { %v1217_v58 = vmax.f32 %v1179_v25, 0.0  ;;  %v1133_v6 = vadd.f32 %v1132_v9, %v1084_v1  ;;  %v1049_v36 = vpop.f32.mrf.mxu3  ;;  %v1100_v25 = vpop.f32.mrf.mxu0 }
 0x163   : > { %v1232_v60 = vpack.c.bf16 %v1217_v58, %v1216_v54 }
 0x165   : > { %1316 = vmatmul.bf16.vlgmr.msra.gmra.mxu3 %v1232_v60 }
 0x166   : > { %v1181_v62 = vpop.f32.mrf.mxu2 }
 0x167   : > { %v1182_v7 = vadd.f32 %v1181_v62, %v1133_v6  ;;  %v1050_v62 = vadd.f32 %v1049_v36, %v2723_v24 }
 0x168   : > { %v1134_v0 = vpop.f32.mrf.mxu1 }
 0x169   : > { %v1135_v35 = vadd.f32 %v1134_v0, %v1086_v5  ;;  %v1218_v12 = vmax.f32 %v1182_v7, 0.0  ;;  %v1051_v42 = vpop.f32.mrf.mxu3  ;;  %v1103_v63 = vpop.f32.mrf.mxu0  ;;  %v1099_v34 = vadd.f32 %v1098_v40, %v1050_v62  ;;  %v2092_v5 = vld [vmem:[%s2978_s5 + $0x18] sm:$0xff] }
 0x16a   : > { %v1052_v1 = vadd.f32 %v1051_v42, %v2730_v37  ;;  %1453 = vmatpush.bf16.msra.mxu0 %v2092_v5 }
 0x16c   : > { %v1101_v6 = vadd.f32 %v1100_v25, %v1052_v1 }
 0x16e   : > { %v1183_v10 = vpop.f32.mrf.mxu2 }
 0x16f   : > { %v1184_v11 = vadd.f32 %v1183_v10, %v1135_v35 }
 0x170   : > { %v1137_v28 = vpop.f32.mrf.mxu1 }
 0x171   : > { %v1219_v13 = vmax.f32 %v1184_v11, 0.0  ;;  %v1138_v27 = vadd.f32 %v1137_v28, %v1089_v56  ;;  %v1054_v61 = vpop.f32.mrf.mxu3  ;;  %v1105_v24 = vpop.f32.mrf.mxu0  ;;  %v2091_v56 = vld [vmem:[%s2978_s5 + $0x10] sm:$0xff] }
 0x172   : > { %v1055_v37 = vadd.f32 %v1054_v61, %v2737_v48  ;;  %1454 = vmatpush.bf16.msra.mxu0 %v2091_v56 }
 0x173   : > { %v1233_v15 = vpack.c.bf16 %v1219_v13, %v1218_v12 }
 0x175   : > { %1321 = vmatmul.bf16.gmra.mxu3 %v1233_v15 }
 0x176   : > { %v1186_v18 = vpop.f32.mrf.mxu2 }
 0x177   : > { %v1187_v29 = vadd.f32 %v1186_v18, %v1138_v27 }
 0x178   : > { %v1139_v44 = vpop.f32.mrf.mxu1 }
 0x179   : > { %v1140_v31 = vadd.f32 %v1139_v44, %v1091_v26  ;;  %v1220_v38 = vmax.f32 %v1187_v29, 0.0  ;;  %v1056_v35 = vpop.f32.mrf.mxu3  ;;  %v1104_v44 = vadd.f32 %v1103_v63, %v1055_v37  ;;  %v1108_v22 = vpop.f32.mrf.mxu0 }
 0x17a   : > { %v1057_v19 = vadd.f32 %v1056_v35, %v2744_v59 }
 0x17c   : > { %v1106_v26 = vadd.f32 %v1105_v24, %v1057_v19 }
 0x17e   : > { %v1188_v32 = vpop.f32.mrf.mxu2 }
 0x17f   : > { %v1189_v57 = vadd.f32 %v1188_v32, %v1140_v31 }
 0x180   : > { %v1142_v53 = vpop.f32.mrf.mxu1 }
 0x181   : > { %v1221_v39 = vmax.f32 %v1189_v57, 0.0  ;;  %v1143_v52 = vadd.f32 %v1142_v53, %v1094_v49  ;;  %v1059_v16 = vpop.f32.mrf.mxu3  ;;  %v1110_v59 = vpop.f32.mrf.mxu0 }
 0x182   : > { %v1060_v40 = vadd.f32 %v1059_v16, %v2753_v4 }
 0x183   : > { %v1234_v2 = vpack.c.bf16 %v1221_v39, %v1220_v38 }
 0x185   : > { %1326 = vmatmul.bf16.gmra.mxu3 %v1234_v2  ;;  %v2090_v2 = vld [vmem:[%s2978_s5 + $0x8] sm:$0xff] }
 0x186   : > { %v1191_v43 = vpop.f32.mrf.mxu2  ;;  %1455 = vmatpush.bf16.msra.mxu0 %v2090_v2 }
 0x187   : > { %v1192_v55 = vadd.f32 %v1191_v43, %v1143_v52 }
 0x188   : > { %v1144_v46 = vpop.f32.mrf.mxu1 }
 0x189   : > { %v1145_v9 = vadd.f32 %v1144_v46, %v1096_v51  ;;  %v1222_v60 = vmax.f32 %v1192_v55, 0.0  ;;  %v1061_v48 = vpop.f32.mrf.mxu3  ;;  %v1109_v46 = vadd.f32 %v1108_v22, %v1060_v40  ;;  %v1113_v25 = vpop.f32.mrf.mxu0 }
 0x18a   : > { %v1062_v43 = vadd.f32 %v1061_v48, %v2759_v14  ;;  %1456 = vmatpush.bf16.msra.mxu0 %v2089_v30 }
 0x18c   : > { %v1111_v50 = vadd.f32 %v1110_v59, %v1062_v43 }
 0x18e   : > { %v1193_v54 = vpop.f32.mrf.mxu2 }
 0x18f   : > { %v1194_v58 = vadd.f32 %v1193_v54, %v1145_v9 }
 0x190   : > { %v1147_v8 = vpop.f32.mrf.mxu1 }
 0x191   : > { %v1223_v20 = vmax.f32 %v1194_v58, 0.0  ;;  %v1148_v7 = vadd.f32 %v1147_v8, %v1099_v34  ;;  %v1064_v49 = vpop.f32.mrf.mxu3  ;;  %v1115_v62 = vpop.f32.mrf.mxu0 }
 0x193   : > { %v1235_v17 = vpack.c.bf16 %v1223_v20, %v1222_v60  ;;  %v1065_v20 = vadd.f32 %v1064_v49, %v2764_v23  ;;  %v2165_v23 = vld [vmem:[%s2977_s4] ss:$0 sm:$0xff] }
 0x195   : > { %1331 = vmatmul.bf16.gmra.mxu3 %v1235_v17  ;;  %v1114_v63 = vadd.f32 %v1113_v25, %v1065_v20 }
 0x196   : > { %v1196_v0 = vpop.f32.mrf.mxu2 }
 0x197   : > { %v1197_v47 = vadd.f32 %v1196_v0, %v1148_v7 }
 0x198   : > { %v1149_v3 = vpop.f32.mrf.mxu1 }
 0x199   : > { %v1150_v10 = vadd.f32 %v1149_v3, %v1101_v6  ;;  %v1224_v13 = vmax.f32 %v1197_v47, 0.0  ;;  %v1066_v60 = vpop.f32.mrf.mxu3 }
 0x19a   : > { %v1067_v17 = vadd.f32 %v1066_v60, %v2766_v33 }
 0x19c   : > { %v1116_v1 = vadd.f32 %v1115_v62, %v1067_v17 }
 0x19e   : > { %v1198_v11 = vpop.f32.mrf.mxu2 }
 0x19f   : > { %v1199_v28 = vadd.f32 %v1198_v11, %v1150_v10 }
 0x1a0   : > { %v1152_v12 = vpop.f32.mrf.mxu1 }
 0x1a1   : > { %v1225_v15 = vmax.f32 %v1199_v28, 0.0  ;;  %v1153_v27 = vadd.f32 %v1152_v12, %v1104_v44 }
 0x1a3   : > { %v1236_v45 = vpack.c.bf16 %v1225_v15, %v1224_v13 }
 0x1a5   : > { %1336 = vmatmul.bf16.gmra.mxu3 %v1236_v45 }
 0x1a6   : > { %v1201_v18 = vpop.f32.mrf.mxu2 }
 0x1a7   : > { %v1202_v29 = vadd.f32 %v1201_v18, %v1153_v27 }
 0x1a8   : > { %v1154_v21 = vpop.f32.mrf.mxu1 }
 0x1a9   : > { %v1155_v31 = vadd.f32 %v1154_v21, %v1106_v26  ;;  %v1226_v53 = vmax.f32 %v1202_v29, 0.0 }
 0x1ae   : > { %v1203_v36 = vpop.f32.mrf.mxu2 }
 0x1af   : > { %v1204_v32 = vadd.f32 %v1203_v36, %v1155_v31 }
 0x1b0   : > { %v1157_v57 = vpop.f32.mrf.mxu1 }
 0x1b1   : > { %v1227_v38 = vmax.f32 %v1204_v32, 0.0  ;;  %v1158_v51 = vadd.f32 %v1157_v57, %v1109_v46 }
 0x1b3   : > { %v1237_v39 = vpack.c.bf16 %v1227_v38, %v1226_v53 }
 0x1b5   : > { %1341 = vmatmul.bf16.gmra.mxu3 %v1237_v39 }
 0x1b6   : > { %v1206_v41 = vpop.f32.mrf.mxu2 }
 0x1b7   : > { %v1207_v4 = vadd.f32 %v1206_v41, %v1158_v51 }
 0x1b8   : > { %v1159_v42 = vpop.f32.mrf.mxu1 }
 0x1b9   : > { %v1160_v52 = vadd.f32 %v1159_v42, %v1111_v50  ;;  %v1228_v58 = vmax.f32 %v1207_v4, 0.0 }
 0x1be   : > { %v1208_v55 = vpop.f32.mrf.mxu2 }
 0x1bf   : > { %v1209_v9 = vadd.f32 %v1208_v55, %v1160_v52 }
 0x1c0   : > { %v1162_v54 = vpop.f32.mrf.mxu1 }
 0x1c1   : > { %v1229_v8 = vmax.f32 %v1209_v9, 0.0  ;;  %v1163_v3 = vadd.f32 %v1162_v54, %v1114_v63 }
 0x1c3   : > { %v1238_v14 = vpack.c.bf16 %v1229_v8, %v1228_v58 }
 0x1c5   : > { %1346 = vmatmul.bf16.gmra.mxu3 %v1238_v14 }
 0x1c6   : > { %v1211_v61 = vpop.f32.mrf.mxu2 }
 0x1c7   : > { %v1212_v34 = vadd.f32 %v1211_v61, %v1163_v3 }
 0x1c8   : > { %v1164_v0 = vpop.f32.mrf.mxu1 }
 0x1c9   : > { %v1165_v5 = vadd.f32 %v1164_v0, %v1116_v1  ;;  %v1230_v35 = vmax.f32 %v1212_v34, 0.0  ;;  %v2166_v34 = vld [vmem:[%s2979_s6] ss:$0 sm:$0xff] }
 0x1ce   : > { %v1213_v6 = vpop.f32.mrf.mxu2 }
 0x1cf   : > { %v1214_v7 = vadd.f32 %v1213_v6, %v1165_v5 }
 0x1d1   : > { %v1231_v47 = vmax.f32 %v1214_v7, 0.0 }
 0x1d3   : > { %v1239_v10 = vpack.c.bf16 %v1231_v47, %v1230_v35 }
 0x1d5   : > { %1351 = vmatmul.bf16.gmra.mxu3 %v1239_v10 }
 0x1e8   : > { %v1317_v11 = vpop.f32.mrf.mxu3 }
 0x1e9   : > { %v1318_v28 = vadd.f32 %v2165_v23, %v1317_v11 }
 0x1eb   : > { %v1357_v12 = vmax.f32 %v1318_v28, 0.0 }
 0x1f0   : > { %v1319_v33 = vpop.f32.mrf.mxu3 }
 0x1f1   : > { %v1320_v24 = vadd.f32 %v2165_v23, %v1319_v33 }
 0x1f3   : > { %v1358_v13 = vmax.f32 %v1320_v24, 0.0 }
 0x1f5   : > { %v1373_v15 = vpack.c.bf16 %v1358_v13, %v1357_v12 }
 0x1f7   : > { %1457 = vmatmul.bf16.vlgmr.msra.gmra.mxu0 %v1373_v15 }
 0x1f8   : > { %v1322_v45 = vpop.f32.mrf.mxu3 }
 0x1f9   : > { %v1323_v37 = vadd.f32 %v2165_v23, %v1322_v45 }
 0x1fb   : > { %v1359_v19 = vmax.f32 %v1323_v37, 0.0 }
 0x200   : > { %v1324_v16 = vpop.f32.mrf.mxu3 }
 0x201   : > { %v1325_v18 = vadd.f32 %v2165_v23, %v1324_v16 }
 0x203   : > { %v1360_v21 = vmax.f32 %v1325_v18, 0.0 }
 0x205   : > { %v1374_v44 = vpack.c.bf16 %v1360_v21, %v1359_v19 }
 0x207   : > { %1462 = vmatmul.bf16.gmra.mxu0 %v1374_v44 }
 0x208   : > { %v1327_v56 = vpop.f32.mrf.mxu3 }
 0x209   : > { %v1328_v22 = vadd.f32 %v2165_v23, %v1327_v56 }
 0x20b   : > { %v1361_v29 = vmax.f32 %v1328_v22, 0.0 }
 0x210   : > { %v1329_v26 = vpop.f32.mrf.mxu3 }
 0x211   : > { %v1330_v27 = vadd.f32 %v2165_v23, %v1329_v26 }
 0x213   : > { %v1362_v31 = vmax.f32 %v1330_v27, 0.0 }
 0x215   : > { %v1375_v36 = vpack.c.bf16 %v1362_v31, %v1361_v29 }
 0x217   : > { %1467 = vmatmul.bf16.gmra.mxu0 %v1375_v36 }
 0x218   : > { %v1332_v32 = vpop.f32.mrf.mxu3 }
 0x219   : > { %v1333_v48 = vadd.f32 %v2165_v23, %v1332_v32 }
 0x21b   : > { %v1363_v38 = vmax.f32 %v1333_v48, 0.0 }
 0x220   : > { %v1334_v57 = vpop.f32.mrf.mxu3 }
 0x221   : > { %v1335_v53 = vadd.f32 %v2165_v23, %v1334_v57 }
 0x223   : > { %v1364_v39 = vmax.f32 %v1335_v53, 0.0 }
 0x225   : > { %v1376_v59 = vpack.c.bf16 %v1364_v39, %v1363_v38 }
 0x227   : > { %1472 = vmatmul.bf16.gmra.mxu0 %v1376_v59 }
 0x228   : > { %v1337_v40 = vpop.f32.mrf.mxu3 }
 0x229   : > { %v1338_v2 = vadd.f32 %v2165_v23, %v1337_v40 }
 0x22b   : > { %v1365_v30 = vmax.f32 %v1338_v2, 0.0 }
 0x230   : > { %v1339_v41 = vpop.f32.mrf.mxu3 }
 0x231   : > { %v1340_v43 = vadd.f32 %v2165_v23, %v1339_v41 }
 0x233   : > { %v1366_v42 = vmax.f32 %v1340_v43, 0.0 }
 0x235   : > { %v1377_v46 = vpack.c.bf16 %v1366_v42, %v1365_v30 }
 0x237   : > { %1477 = vmatmul.bf16.gmra.mxu0 %v1377_v46 }
 0x238   : > { %v1342_v49 = vpop.f32.mrf.mxu3 }
 0x239   : > { %v1343_v50 = vadd.f32 %v2165_v23, %v1342_v49 }
 0x23b   : > { %v1367_v52 = vmax.f32 %v1343_v50, 0.0 }
 0x240   : > { %v1344_v51 = vpop.f32.mrf.mxu3 }
 0x241   : > { %v1345_v4 = vadd.f32 %v2165_v23, %v1344_v51 }
 0x243   : > { %v1368_v25 = vmax.f32 %v1345_v4, 0.0 }
 0x245   : > { %v1378_v55 = vpack.c.bf16 %v1368_v25, %v1367_v52 }
 0x247   : > { %1482 = vmatmul.bf16.gmra.mxu0 %v1378_v55 }
 0x248   : > { %v1347_v9 = vpop.f32.mrf.mxu3 }
 0x249   : > { %v1348_v54 = vadd.f32 %v2165_v23, %v1347_v9 }
 0x24b   : > { %v1369_v14 = vmax.f32 %v1348_v54, 0.0 }
 0x250   : > { %v1349_v58 = vpop.f32.mrf.mxu3 }
 0x251   : > { %v1350_v8 = vadd.f32 %v2165_v23, %v1349_v58 }
 0x253   : > { %v1370_v60 = vmax.f32 %v1350_v8, 0.0 }
 0x255   : > { %v1379_v20 = vpack.c.bf16 %v1370_v60, %v1369_v14 }
 0x257   : > { %1487 = vmatmul.bf16.gmra.mxu0 %v1379_v20 }
 0x258   : > { %v1352_v61 = vpop.f32.mrf.mxu3 }
 0x259   : > { %v1353_v17 = vadd.f32 %v2165_v23, %v1352_v61 }
 0x25b   : > { %v1371_v0 = vmax.f32 %v1353_v17, 0.0 }
 0x260   : > { %v1354_v62 = vpop.f32.mrf.mxu3 }
 0x261   : > { %v1355_v63 = vadd.f32 %v2165_v23, %v1354_v62 }
 0x263   : > { %v1372_v1 = vmax.f32 %v1355_v63, 0.0 }
 0x265   : > { %v1380_v3 = vpack.c.bf16 %v1372_v1, %v1371_v0 }
 0x267   : > { %1492 = vmatmul.bf16.gmra.mxu0 %v1380_v3 }
 0x274   : > { %v1458_v5 = vpop.f32.mrf.mxu0 }
 0x275   : > { %v1459_v6 = vadd.f32 %v2166_v34, %v1458_v5 }
 0x277   : > { %1498 = vmax.xlane.f32.xlu0 %v1459_v6 }
 0x27c   : > { %v1460_v7 = vpop.f32.mrf.mxu0 }
 0x27d   : > { %v1461_v35 = vadd.f32 %v2166_v34, %v1460_v7 }
 0x27f   : > { %1500 = vmax.xlane.f32.xlu0 %v1461_v35 }
 0x284   : > { %v1463_v47 = vpop.f32.mrf.mxu0 }
 0x285   : > { %v1464_v10 = vadd.f32 %v2166_v34, %v1463_v47 }
 0x287   : > { %1502 = vmax.xlane.f32.xlu1 %v1464_v10 }
 0x28c   : > { %v1465_v11 = vpop.f32.mrf.mxu0 }
 0x28d   : > { %v1466_v28 = vadd.f32 %v2166_v34, %v1465_v11 }
 0x28f   : > { %1504 = vmax.xlane.f32.xlu1 %v1466_v28 }
 0x294   : > { %v1468_v23 = vpop.f32.mrf.mxu0 }
 0x295   : > { %v1469_v33 = vadd.f32 %v2166_v34, %v1468_v23 }
 0x297   : > { %1506 = vmax.xlane.f32.xlu2 %v1469_v33 }
 0x29c   : > { %v1470_v24 = vpop.f32.mrf.mxu0 }
 0x29d   : > { %v1471_v12 = vadd.f32 %v2166_v34, %v1470_v24 }
 0x29f   : > { %1508 = vmax.xlane.f32.xlu2 %v1471_v12 }
 0x2a4   : > { %v1473_v13 = vpop.f32.mrf.mxu0 }
 0x2a5   : > { %v2814_v15 = vadd.f32 %v2166_v34, %v1473_v13 }
 0x2a7   : > { %1510 = vmax.xlane.f32.xlu0 %v2814_v15 }
 0x2ac   : > { %v1475_v45 = vpop.f32.mrf.mxu0 }
 0x2ad   : > { %v2817_v37 = vadd.f32 %v2166_v34, %v1475_v45 }
 0x2af   : > { %1512 = vmax.xlane.f32.xlu1 %v2817_v37 }
 0x2b4   : > { %v1478_v16 = vpop.f32.mrf.mxu0 }
 0x2b5   : > { %v2820_v18 = vadd.f32 %v2166_v34, %v1478_v16 }
 0x2b7   : > { %1514 = vmax.xlane.f32.xlu2 %v2820_v18 }
 0x2bc   : > { %v1480_v19 = vpop.f32.mrf.mxu0 }
 0x2bd   : > { %v2823_v21 = vadd.f32 %v2166_v34, %v1480_v19 }
 0x2bf   : > { %1516 = vmax.xlane.f32.xlu0 %v2823_v21 }
 0x2c4   : > { %v1483_v44 = vpop.f32.mrf.mxu0 }
 0x2c5   : > { %v2826_v56 = vadd.f32 %v2166_v34, %v1483_v44 }
 0x2c7   : > { %1518 = vmax.xlane.f32.xlu1 %v2826_v56 }
 0x2cc   : > { %v1485_v22 = vpop.f32.mrf.mxu0 }
 0x2cd   : > { %v2829_v26 = vadd.f32 %v2166_v34, %v1485_v22 }
 0x2cf   : > { %1520 = vmax.xlane.f32.xlu2 %v2829_v26 }
 0x2d4   : > { %v1488_v27 = vpop.f32.mrf.mxu0 }
 0x2d5   : > { %v2832_v29 = vadd.f32 %v2166_v34, %v1488_v27 }
 0x2d7   : > { %1522 = vmax.xlane.f32.xlu0 %v2832_v29 }
 0x2dc   : > { %v1490_v31 = vpop.f32.mrf.mxu0 }
 0x2dd   : > { %v2835_v36 = vadd.f32 %v2166_v34, %v1490_v31 }
 0x2df   : > { %1524 = vmax.xlane.f32.xlu1 %v2835_v36 }
 0x2e4   : > { %v1493_v32 = vpop.f32.mrf.mxu0 }
 0x2e5   : > { %v2838_v48 = vadd.f32 %v2166_v34, %v1493_v32 }
 0x2e7   : > { %1526 = vmax.xlane.f32.xlu2 %v2838_v48 }
 0x2ea   : > { %v1499_v57 = vpop.xlane.xlu0 %1498 }
 0x2eb   : > { %v2841_v53 = vsub.f32 %v1459_v6, %v1499_v57 }
 0x2ec   : > { %v1495_v38 = vpop.f32.mrf.mxu0 }
 0x2ed   : > { %v1546_v39 = vmul.f32 1.442695, %v2841_v53  ;;  %v2844_v59 = vadd.f32 %v2166_v34, %v1495_v38 }
 0x2ef   : > { %2167 = vpow2.f32 %v1546_v39  ;;  %1528 = vmax.xlane.f32.xlu0 %v2844_v59 }
 0x2f2   : > { %v1501_v40 = vpop.xlane.xlu0 %1500 }
 0x2f3   : > { %v2847_v2 = vsub.f32 %v1461_v35, %v1501_v40 }
 0x2f5   : > { %v2168_v41 = vpop.eup %2167  ;;  %v1548_v43 = vmul.f32 1.442695, %v2847_v2 }
 0x2f6   : > { %1578 = vadd.xlane.f32.xlu1 %v2168_v41 }
 0x2f7   : > { %2169 = vpow2.f32 %v1548_v43 }
 0x2fa   : > { %v1503_v30 = vpop.xlane.xlu1 %1502 }
 0x2fb   : > { %v2850_v42 = vsub.f32 %v1464_v10, %v1503_v30 }
 0x2fd   : > { %v2170_v46 = vpop.eup %2169  ;;  %v1550_v49 = vmul.f32 1.442695, %v2850_v42 }
 0x2fe   : > { %1580 = vadd.xlane.f32.xlu2 %v2170_v46 }
 0x2ff   : > { %2171 = vpow2.f32 %v1550_v49 }
 0x302   : > { %v1505_v50 = vpop.xlane.xlu1 %1504 }
 0x303   : > { %v2853_v51 = vsub.f32 %v1466_v28, %v1505_v50 }
 0x305   : > { %v2172_v4 = vpop.eup %2171  ;;  %v1552_v52 = vmul.f32 1.442695, %v2853_v51 }
 0x306   : > { %1582 = vadd.xlane.f32.xlu0 %v2172_v4 }
 0x307   : > { %2173 = vpow2.f32 %v1552_v52 }
 0x30a   : > { %v1507_v25 = vpop.xlane.xlu2 %1506 }
 0x30b   : > { %v2856_v55 = vsub.f32 %v1469_v33, %v1507_v25 }
 0x30d   : > { %v2174_v9 = vpop.eup %2173  ;;  %v1554_v54 = vmul.f32 1.442695, %v2856_v55 }
 0x30e   : > { %1584 = vadd.xlane.f32.xlu1 %v2174_v9 }
 0x30f   : > { %2175 = vpow2.f32 %v1554_v54 }
 0x312   : > { %v1509_v58 = vpop.xlane.xlu2 %1508 }
 0x313   : > { %v2859_v8 = vsub.f32 %v1471_v12, %v1509_v58 }
 0x315   : > { %v2176_v14 = vpop.eup %2175  ;;  %v1556_v60 = vmul.f32 1.442695, %v2859_v8 }
 0x316   : > { %1586 = vadd.xlane.f32.xlu2 %v2176_v14 }
 0x317   : > { %2177 = vpow2.f32 %v1556_v60 }
 0x31a   : > { %v1511_v20 = vpop.xlane.xlu0 %1510 }
 0x31b   : > { %v2863_v61 = vsub.f32 %v2814_v15, %v1511_v20 }
 0x31d   : > { %v2178_v17 = vpop.eup %2177  ;;  %v1558_v62 = vmul.f32 1.442695, %v2863_v61 }
 0x31e   : > { %1588 = vadd.xlane.f32.xlu0 %v2178_v17 }
 0x31f   : > { %2179 = vpow2.f32 %v1558_v62 }
 0x322   : > { %v1513_v63 = vpop.xlane.xlu1 %1512 }
 0x323   : > { %v2867_v0 = vsub.f32 %v2817_v37, %v1513_v63 }
 0x325   : > { %v2180_v1 = vpop.eup %2179  ;;  %v1560_v3 = vmul.f32 1.442695, %v2867_v0 }
 0x326   : > { %1590 = vadd.xlane.f32.xlu1 %v2180_v1 }
 0x327   : > { %2181 = vpow2.f32 %v1560_v3 }
 0x32a   : > { %v1515_v34 = vpop.xlane.xlu2 %1514 }
 0x32b   : > { %v2871_v5 = vsub.f32 %v2820_v18, %v1515_v34 }
 0x32d   : > { %v2182_v6 = vpop.eup %2181  ;;  %v1562_v7 = vmul.f32 1.442695, %v2871_v5 }
 0x32e   : > { %1592 = vadd.xlane.f32.xlu2 %v2182_v6 }
 0x32f   : > { %2183 = vpow2.f32 %v1562_v7 }
 0x332   : > { %v1517_v35 = vpop.xlane.xlu0 %1516 }
 0x333   : > { %v2875_v47 = vsub.f32 %v2823_v21, %v1517_v35 }
 0x335   : > { %v2184_v10 = vpop.eup %2183  ;;  %v1564_v11 = vmul.f32 1.442695, %v2875_v47 }
 0x336   : > { %1594 = vadd.xlane.f32.xlu0 %v2184_v10 }
 0x337   : > { %2185 = vpow2.f32 %v1564_v11 }
 0x33a   : > { %v1519_v28 = vpop.xlane.xlu1 %1518 }
 0x33b   : > { %v2879_v23 = vsub.f32 %v2826_v56, %v1519_v28 }
 0x33d   : > { %v2186_v33 = vpop.eup %2185  ;;  %v1566_v24 = vmul.f32 1.442695, %v2879_v23 }
 0x33e   : > { %1596 = vadd.xlane.f32.xlu1 %v2186_v33 }
 0x33f   : > { %2187 = vpow2.f32 %v1566_v24 }
 0x342   : > { %v1521_v12 = vpop.xlane.xlu2 %1520 }
 0x343   : > { %v2883_v13 = vsub.f32 %v2829_v26, %v1521_v12 }
 0x345   : > { %v2188_v15 = vpop.eup %2187  ;;  %v1568_v45 = vmul.f32 1.442695, %v2883_v13 }
 0x346   : > { %1598 = vadd.xlane.f32.xlu2 %v2188_v15 }
 0x347   : > { %2189 = vpow2.f32 %v1568_v45 }
 0x34a   : > { %v1523_v37 = vpop.xlane.xlu0 %1522 }
 0x34b   : > { %v2887_v16 = vsub.f32 %v2832_v29, %v1523_v37 }
 0x34d   : > { %v2190_v18 = vpop.eup %2189  ;;  %v1570_v19 = vmul.f32 1.442695, %v2887_v16 }
 0x34e   : > { %1600 = vadd.xlane.f32.xlu0 %v2190_v18 }
 0x34f   : > { %2191 = vpow2.f32 %v1570_v19 }
 0x352   : > { %v1525_v21 = vpop.xlane.xlu1 %1524 }
 0x353   : > { %v2891_v44 = vsub.f32 %v2835_v36, %v1525_v21 }
 0x355   : > { %v2192_v56 = vpop.eup %2191  ;;  %v1572_v22 = vmul.f32 1.442695, %v2891_v44 }
 0x356   : > { %1602 = vadd.xlane.f32.xlu1 %v2192_v56 }
 0x357   : > { %2193 = vpow2.f32 %v1572_v22 }
 0x35a   : > { %v1527_v26 = vpop.xlane.xlu2 %1526 }
 0x35b   : > { %v2895_v27 = vsub.f32 %v2838_v48, %v1527_v26 }
 0x35d   : > { %v2194_v29 = vpop.eup %2193  ;;  %v1574_v31 = vmul.f32 1.442695, %v2895_v27 }
 0x35e   : > { %1604 = vadd.xlane.f32.xlu2 %v2194_v29 }
 0x35f   : > { %2195 = vpow2.f32 %v1574_v31 }
 0x362   : > { %v1529_v32 = vpop.xlane.xlu0 %1528 }
 0x363   : > { %v2899_v36 = vsub.f32 %v2844_v59, %v1529_v32 }
 0x365   : > { %v2196_v57 = vpop.eup %2195  ;;  %v1576_v38 = vmul.f32 1.442695, %v2899_v36 }
 0x366   : > { %1606 = vadd.xlane.f32.xlu0 %v2196_v57 }
 0x367   : > { %2197 = vpow2.f32 %v1576_v38 }
 0x369   : > { %v1579_v39 = vpop.xlane.xlu1 %1578 }
 0x36a   : > { %2199 = vlog2.f32 %v1579_v39 }
 0x36d   : > { %v2198_v48 = vpop.eup %2197 }
 0x36e   : > { %1608 = vadd.xlane.f32.xlu1 %v2198_v48 }
 0x370   : > { %v2200_v40 = vpop.eup %2199 }
 0x371   : > { %v1611_v41 = vmul.f32 0.6931472, %v2200_v40  ;;  %v1581_v43 = vpop.xlane.xlu2 %1580 }
 0x372   : > { %2201 = vlog2.f32 %v1581_v43 }
 0x373   : > { %v1642_v30 = vsub.f32 %v2841_v53, %v1611_v41 }
 0x375   : > { %1658 = vst [vmem:[%s2906_s23] sm:$0xff] %v1642_v30 }
 0x378   : > { %v2202_v59 = vpop.eup %2201 }
 0x379   : > { %v1613_v46 = vmul.f32 0.6931472, %v2202_v59  ;;  %v1583_v49 = vpop.xlane.xlu0 %1582 }
 0x37a   : > { %2203 = vlog2.f32 %v1583_v49 }
 0x37b   : > { %v1643_v50 = vsub.f32 %v2847_v2, %v1613_v46 }
 0x37d   : > { %1659 = vst [vmem:[%s2906_s23 + $0x8] sm:$0xff] %v1643_v50 }
 0x380   : > { %v2204_v4 = vpop.eup %2203 }
 0x381   : > { %v1615_v52 = vmul.f32 0.6931472, %v2204_v4  ;;  %v1585_v25 = vpop.xlane.xlu1 %1584 }
 0x382   : > { %2205 = vlog2.f32 %v1585_v25 }
 0x383   : > { %v1644_v53 = vsub.f32 %v2850_v42, %v1615_v52 }
 0x385   : > { %1660 = vst [vmem:[%s2906_s23 + $0x10] sm:$0xff] %v1644_v53 }
 0x388   : > { %v2206_v9 = vpop.eup %2205 }
 0x389   : > { %v1617_v54 = vmul.f32 0.6931472, %v2206_v9  ;;  %v1587_v58 = vpop.xlane.xlu2 %1586 }
 0x38a   : > { %2207 = vlog2.f32 %v1587_v58 }
 0x38b   : > { %v1645_v14 = vsub.f32 %v2853_v51, %v1617_v54 }
 0x38d   : > { %1661 = vst [vmem:[%s2906_s23 + $0x18] sm:$0xff] %v1645_v14 }
 0x390   : > { %v2208_v60 = vpop.eup %2207 }
 0x391   : > { %v1619_v20 = vmul.f32 0.6931472, %v2208_v60  ;;  %v1589_v2 = vpop.xlane.xlu0 %1588 }
 0x392   : > { %2209 = vlog2.f32 %v1589_v2 }
 0x393   : > { %v1646_v17 = vsub.f32 %v2856_v55, %v1619_v20 }
 0x395   : > { %1662 = vst [vmem:[%s2906_s23 + $0x20] sm:$0xff] %v1646_v17 }
 0x398   : > { %v2210_v62 = vpop.eup %2209 }
 0x399   : > { %v1621_v63 = vmul.f32 0.6931472, %v2210_v62  ;;  %v1591_v42 = vpop.xlane.xlu1 %1590 }
 0x39a   : > { %2211 = vlog2.f32 %v1591_v42 }
 0x39b   : > { %v1647_v1 = vsub.f32 %v2859_v8, %v1621_v63 }
 0x39d   : > { %1663 = vst [vmem:[%s2906_s23 + $0x28] sm:$0xff] %v1647_v1 }
 0x3a0   : > { %v2212_v3 = vpop.eup %2211 }
 0x3a1   : > { %v1623_v34 = vmul.f32 0.6931472, %v2212_v3  ;;  %v1593_v51 = vpop.xlane.xlu2 %1592 }
 0x3a2   : > { %2213 = vlog2.f32 %v1593_v51 }
 0x3a3   : > { %v1648_v6 = vsub.f32 %v2863_v61, %v1623_v34 }
 0x3a5   : > { %1664 = vst [vmem:[%s2906_s23 + $0x30] sm:$0xff] %v1648_v6 }
 0x3a8   : > { %v2214_v7 = vpop.eup %2213 }
 0x3a9   : > { %v1625_v35 = vmul.f32 0.6931472, %v2214_v7  ;;  %v1595_v55 = vpop.xlane.xlu0 %1594 }
 0x3aa   : > { %2215 = vlog2.f32 %v1595_v55 }
 0x3ab   : > { %v1649_v10 = vsub.f32 %v2867_v0, %v1625_v35 }
 0x3ad   : > { %1665 = vst [vmem:[%s2906_s23 + $0x38] sm:$0xff] %v1649_v10 }
 0x3b0   : > { %v2216_v11 = vpop.eup %2215 }
 0x3b1   : > { %v1627_v28 = vmul.f32 0.6931472, %v2216_v11  ;;  %v1597_v8 = vpop.xlane.xlu1 %1596 }
 0x3b2   : > { %2217 = vlog2.f32 %v1597_v8 }
 0x3b3   : > { %v1650_v33 = vsub.f32 %v2871_v5, %v1627_v28 }
 0x3b5   : > { %1666 = vst [vmem:[%s2906_s23 + $0x40] sm:$0xff] %v1650_v33 }
 0x3b8   : > { %v2218_v24 = vpop.eup %2217 }
 0x3b9   : > { %v1629_v12 = vmul.f32 0.6931472, %v2218_v24  ;;  %v1599_v61 = vpop.xlane.xlu2 %1598 }
 0x3ba   : > { %2219 = vlog2.f32 %v1599_v61 }
 0x3bb   : > { %v1651_v15 = vsub.f32 %v2875_v47, %v1629_v12 }
 0x3bd   : > { %1667 = vst [vmem:[%s2906_s23 + $0x48] sm:$0xff] %v1651_v15 }
 0x3c0   : > { %v2220_v45 = vpop.eup %2219 }
 0x3c1   : > { %v1631_v37 = vmul.f32 0.6931472, %v2220_v45  ;;  %v1601_v0 = vpop.xlane.xlu0 %1600 }
 0x3c2   : > { %2221 = vlog2.f32 %v1601_v0 }
 0x3c3   : > { %v1652_v18 = vsub.f32 %v2879_v23, %v1631_v37 }
 0x3c5   : > { %1668 = vst [vmem:[%s2906_s23 + $0x50] sm:$0xff] %v1652_v18 }
 0x3c8   : > { %v2222_v19 = vpop.eup %2221 }
 0x3c9   : > { %v1633_v21 = vmul.f32 0.6931472, %v2222_v19  ;;  %v1603_v5 = vpop.xlane.xlu1 %1602 }
 0x3ca   : > { %2223 = vlog2.f32 %v1603_v5 }
 0x3cb   : > { %v1653_v56 = vsub.f32 %v2883_v13, %v1633_v21 }
 0x3cd   : > { %1669 = vst [vmem:[%s2906_s23 + $0x58] sm:$0xff] %v1653_v56 }
 0x3d0   : > { %v2224_v22 = vpop.eup %2223 }
 0x3d1   : > { %v1635_v47 = vmul.f32 0.6931472, %v2224_v22  ;;  %v1605_v26 = vpop.xlane.xlu2 %1604 }
 0x3d2   : > { %2225 = vlog2.f32 %v1605_v26 }
 0x3d3   : > { %v1654_v29 = vsub.f32 %v2887_v16, %v1635_v47 }
 0x3d5   : > { %1670 = vst [vmem:[%s2906_s23 + $0x60] sm:$0xff] %v1654_v29 }
 0x3d8   : > { %v2226_v23 = vpop.eup %2225 }
 0x3d9   : > { %v1637_v31 = vmul.f32 0.6931472, %v2226_v23  ;;  %v1607_v32 = vpop.xlane.xlu0 %1606 }
 0x3da   : > { %2227 = vlog2.f32 %v1607_v32 }
 0x3db   : > { %v1655_v57 = vsub.f32 %v2891_v44, %v1637_v31 }
 0x3dd   : > { %1671 = vst [vmem:[%s2906_s23 + $0x68] sm:$0xff] %v1655_v57 }
 0x3e0   : > { %v2228_v13 = vpop.eup %2227 }
 0x3e1   : > { %v1639_v38 = vmul.f32 0.6931472, %v2228_v13  ;;  %v1609_v39 = vpop.xlane.xlu1 %1608 }
 0x3e2   : > { %2229 = vlog2.f32 %v1609_v39 }
 0x3e3   : > { %v1656_v48 = vsub.f32 %v2895_v27, %v1639_v38 }
 0x3e5   : > { %1672 = vst [vmem:[%s2906_s23 + $0x70] sm:$0xff] %v1656_v48 }
 0x3e8   : > { %v2230_v16 = vpop.eup %2229 }
 0x3e9   : > { %v1641_v44 = vmul.f32 0.6931472, %v2230_v16 }
 0x3eb   : > { %v1657_v40 = vsub.f32 %v2899_v36, %v1641_v44 }
 0x3ed   : > { %1673 = vst [vmem:[%s2906_s23 + $0x78] sm:$0xff] %v1657_v40 }
 0x3ee   : > { %2258 = shalt.err (!%p2255_p3)
}
 0x3ef   : > { %s2295_s21 = smov 128   ;;  %s2296_s23 = smov 8  }
 0x3f0   : > { %2123 = dma.vmem_to_hbm [thread:$0]  (%p2375_p5), %s1688_s14, 2048, %s1690_s17, %s1675_s28, %s2295_s21, %s2295_s21, %s2296_s23  }
 0x3f1 PF: > { %p2129_p4 = scmp.ge.s32.totalorder %s2293_s27, 2  ;;  %s1704_s8 = sand.u32 1, %s2281_s24  }
 0x3f2   : > { %s1705_s9 = scalar_lea.sflag [#allocation3], %s1704_s8 }
 0x3f3   : > { %p2126_p7 = pnand %p2129_p4, %p2379_p6 }
 0x3f5   : > { %p2127_p8 = pneg %p2126_p7 }
 0x3f7   : > { %2276 = dma.done.wait (%p2127_p8), %s1705_s9, 2048  }
 0x3f8   : > { %2278 = vsyncadd (%p2127_p8), %s1705_s9, 4294965248  ;;  %p17_p9 = scmp.ge.s32.totalorder %s2362_s30, 4   ;;  %s2983_s24 = smov %s2285_s25 }
 0x3f9   : > { %s2984_s25 = smov %s2289_s26  ;;  %s2985_s26 = smov %s2373_s10 }
 0x3fa   : > { %s2986_s27 = smov %s2362_s30  ;;  %19 = sbr.rel (!%p17_p9) target bundleno = 3 (0x3), region = 83 }
 0x3ff   :  { %1711 = vsyncpa [#allocation3], 1 }
 0x400   :  { %1713 = vsyncpa [#allocation3 + $0x1], 1 }

</bundles_post_ra>
